<compile_context>
chip_gen: v5e
topology: v5e:2x2
jax: 0.10.0
libtpu: 0.0.40
codegen_flags: <defaults>
</compile_context>

<pallas_src>
import functools

import jax
import jax.numpy as jnp
from jax.experimental import pallas as pl
from jax.experimental.pallas import tpu as pltpu


def _round_up(x, m):
    return ((x + m - 1) // m) * m


def _device_vmem_bytes():
    """Physical VMEM estimate; conservative (v7x = 64 MiB/TC) when unknown.

    Note: on v7x the reported capacity may be per-chip; the conservative
    budgeting fractions below keep the working set far from the per-core cap.
    """
    cap = 64 * 1024 * 1024
    try:  # hardware capability query only — a failed probe falls back safely
        reported = int(pltpu.get_tpu_info().vmem_capacity_bytes)
        if reported > 0:
            cap = reported
    except Exception:
        pass
    return min(max(cap, 32 * 1024 * 1024), 128 * 1024 * 1024)


def _critic_kernel(x_ref, w1_ref, b1_ref, w2_ref, b2_ref, w3_ref, b3_ref, o_ref):
    """Fused 3-layer critic MLP for one batch tile.

    x_ref:  (tb, F)   states dtype (f32); cast per-tile to the weights' dtype
    w1_ref: (F, H)    compute dtype (f32 or bf16)
    b1_ref: (1, H)    f32
    w2_ref: (H, H)    compute dtype
    b2_ref: (1, H)    f32
    w3_ref: (H, 1)    f32 column
    b3_ref: (1,)      f32 scalar in SMEM
    o_ref:  (tb, 1)   f32 per-row state values for this tile
    """
    cdt = w1_ref.dtype
    x = x_ref[...].astype(cdt)                # VPU cast, hidden under the MXU

    # Layer 1: MXU matmul, f32 accumulation; bias + ReLU epilogue in f32.
    h1 = jnp.dot(x, w1_ref[...], preferred_element_type=jnp.float32)
    h1 = jnp.maximum(h1 + b1_ref[...], 0.0)

    # Layer 2 (activations cast back to the MXU compute dtype).
    h2 = jnp.dot(h1.astype(w2_ref.dtype), w2_ref[...],
                 preferred_element_type=jnp.float32)
    h2 = jnp.maximum(h2 + b2_ref[...], 0.0)

    # Layer 3: plain (tb,H)@(H,1) matmul — one stationary weight load, no
    # transposed operands, no relayout of the (tb,H) activations.
    col = jnp.dot(h2, w3_ref[...], preferred_element_type=jnp.float32)
    o_ref[...] = (col + b3_ref[0]).astype(o_ref.dtype)


@functools.partial(jax.jit, static_argnames=("block_b",))
def _critic_forward(states, w1, b1, w2, b2, w3, b3, *, block_b=None):
    B, F = states.shape
    H = w1.shape[1]
    x_item = jnp.dtype(states.dtype).itemsize     # streamed as-is (f32: 4 B)
    w_item = jnp.dtype(w1.dtype).itemsize         # layer-1/2 compute dtype

    device_vmem = _device_vmem_bytes()

    # --- batch tile sizing (bytes-driven) -----------------------------------
    sub = 8                                        # f32 sublane packing
    # Block-dependent VMEM per row: double-buffered states + output tiles plus
    # live f32 activations (h1, h2, dot outputs) and their compute-dtype cast
    # copies (x and h1 casts on the bf16 path).
    per_row_vmem = (2 * F * x_item + 2 * 4
                    + 3 * H * 4 + H * w_item + F * w_item)
    vmem_rows = max(sub, int(0.35 * device_vmem) // per_row_vmem)
    if block_b is None:
        # ~2 MiB of streamed states per grid step amortizes per-step overhead.
        target_rows = (2 * 1024 * 1024) // max(1, F * x_item)
        block_b = max(512, min(4096, target_rows))
    block_b = min(block_b, vmem_rows, _round_up(B, sub))
    block_b = max(sub, _round_up(block_b, sub))
    grid_b = pl.cdiv(B, block_b)                   # ragged tail handled by Pallas

    # --- small operands (tiny reshapes/casts; the big W1/W2 are used in the
    #     caller-provided dtype — pre-cast them ONCE via prepare_critic_params,
    #     never per forward) --------------------------------------------------
    b1r = b1.reshape(1, H).astype(jnp.float32)
    b2r = b2.reshape(1, H).astype(jnp.float32)
    w3c = w3.reshape(H, 1).astype(jnp.float32)     # (H, 1) column, f32
    b3s = b3.reshape(1).astype(jnp.float32)        # scalar, lives in SMEM

    # --- VMEM budget / compiler params ---------------------------------------
    weight_vmem = 2 * ((F * H + H * H) * w_item + 3 * H * 4)  # double-buffered
    vmem_need = weight_vmem + block_b * per_row_vmem
    # Always provision (v5e default scoped limit is only 16 MiB); never request
    # more than ~90% of the device VMEM (v7x: 64 MiB per TensorCore).
    vmem_limit = int(min(0.9 * device_vmem,
                         max(32 * 1024 * 1024, 1.4 * vmem_need)))
    compiler_params = pltpu.CompilerParams(
        dimension_semantics=("parallel",),
        vmem_limit_bytes=vmem_limit,
    )
    # TODO(synk): on v7x, use CORE_PARALLEL on the batch axis (2 TC/chip) and
    # add a hidden-dim grid axis + f32 accumulator once F*H + H*H approaches
    # the 64 MiB per-core VMEM; kept "parallel" here since CORE_PARALLEL is not
    # valid on single-core v5e/v6e targets.

    cost = pl.CostEstimate(
        flops=2 * B * (F * H + H * H + H),
        transcendentals=0,
        bytes_accessed=(B * F * x_item                 # states (read once)
                        + (F * H + H * H) * w_item     # W1, W2
                        + (3 * H + 1) * 4              # b1, b2, W3, b3
                        + B * 4),                      # output
    )

    out = pl.pallas_call(
        _critic_kernel,
        out_shape=jax.ShapeDtypeStruct((B, 1), jnp.float32),
        grid_spec=pltpu.PrefetchScalarGridSpec(
            num_scalar_prefetch=0,
            grid=(grid_b,),
            in_specs=[
                pl.BlockSpec((block_b, F), lambda i: (i, 0)),       # states tile
                pl.BlockSpec((F, H), lambda i: (0, 0)),             # W1
                pl.BlockSpec((1, H), lambda i: (0, 0)),             # b1
                pl.BlockSpec((H, H), lambda i: (0, 0)),             # W2
                pl.BlockSpec((1, H), lambda i: (0, 0)),             # b2
                pl.BlockSpec((H, 1), lambda i: (0, 0)),             # W3 column
                pl.BlockSpec(memory_space=pltpu.MemorySpace.SMEM),  # b3 scalar
            ],
            out_specs=pl.BlockSpec((block_b, 1), lambda i: (i, 0)),
        ),
        compiler_params=compiler_params,
        cost_estimate=cost,
    )(states, w1, b1r, w2, b2r, w3c, b3s)

    return out.reshape(B)          # (B,) — matches .squeeze(1)


def critic_net_forward(states, w1, b1, w2, b2, w3, b3, *, block_b=None):
    """states: (B, F) float32 -> (B,) float32 (CriticNet.forward semantics).

    Layers 1/2 run on the MXU in w1/w2's dtype (pass bf16 weights from
    prepare_critic_params for the fast path); accumulation, biases, ReLU and
    the output are f32.
    """
    return _critic_forward(states, w1, b1, w2, b2, w3, b3, block_b=block_b)


def prepare_critic_params(w1, b1, w2, b2, w3, b3, compute_dtype=jnp.bfloat16):
    """Cast the two large weight matrices ONCE, outside the jitted forward.

    The MXU is bf16-native on v5e/v6e/v7x; bf16 W1/W2 halve weight HBM/VMEM
    traffic and avoid multi-pass f32 matmuls.  Biases and the tiny last layer
    stay f32 (they define the epilogue/output precision).
    """
    return (w1.astype(compute_dtype), b1.astype(jnp.float32),
            w2.astype(compute_dtype), b2.astype(jnp.float32),
            w3.astype(jnp.float32), b3.astype(jnp.float32))


def init_critic_params(key, nr_input_features, nr_hidden_units):
    """Deterministic PyTorch-style init: U(-1/sqrt(fan_in), 1/sqrt(fan_in))."""
    ks = jax.random.split(key, 6)

    def lin(kw, kb, fan_in, fan_out):
        bound = 1.0 / jnp.sqrt(jnp.float32(fan_in))
        w = jax.random.uniform(kw, (fan_in, fan_out), jnp.float32, -bound, bound)
        b = jax.random.uniform(kb, (1, fan_out), jnp.float32, -bound, bound)
        return w, b

    w1, b1 = lin(ks[0], ks[1], nr_input_features, nr_hidden_units)
    w2, b2 = lin(ks[2], ks[3], nr_hidden_units, nr_hidden_units)
    w3, b3 = lin(ks[4], ks[5], nr_hidden_units, 1)
    return w1, b1, w2, b2, w3, b3


def critic_net_reference(states, w1, b1, w2, b2, w3, b3):
    """Pure-JAX reference of the PyTorch forward."""
    h1 = jnp.maximum(states @ w1 + b1, 0.0)
    h2 = jnp.maximum(h1 @ w2 + b2, 0.0)
    return (h2 @ w3 + b3)[:, 0]


if __name__ == "__main__":
    key = jax.random.PRNGKey(0)
    k_params, k_states = jax.random.split(key)

    # Main config: MXU/vreg-friendly dims, ragged batch (200 % 128 != 0) so the
    # un-padded edge-block path and a multi-step pipelined grid are exercised.
    B, F, H = 200, 128, 256
    params = init_critic_params(k_params, F, H)
    states = jax.random.normal(k_states, (B, F), jnp.float32)
    ref = critic_net_reference(states, *params)

    # f32 path, explicit small tile -> 2-step grid with a ragged last tile.
    out = jax.block_until_ready(critic_net_forward(states, *params, block_b=128))
    assert out.shape == (B,), out.shape
    assert jnp.allclose(out, ref, atol=1e-3, rtol=1e-3), (out[:4], ref[:4])

    # f32 path, default bytes-driven tile policy.
    out_d = jax.block_until_ready(critic_net_forward(states, *params))
    assert out_d.shape == (B,), out_d.shape
    assert jnp.allclose(out_d, ref, atol=1e-3, rtol=1e-3), (out_d[:4], ref[:4])

    # bf16 compute path: W1/W2 cast ONCE outside the jitted forward.
    params_bf16 = prepare_critic_params(*params)
    out_bf16 = jax.block_until_ready(critic_net_forward(states, *params_bf16))
    assert out_bf16.shape == (B,), out_bf16.shape
    assert jnp.allclose(out_bf16, ref, atol=1e-1, rtol=1e-1), (out_bf16[:4], ref[:4])

    # Small, non-aligned config (B below the sublane multiple, small F/H).
    B2, F2, H2 = 6, 24, 32
    params2 = init_critic_params(jax.random.PRNGKey(1), F2, H2)
    states2 = jax.random.normal(jax.random.PRNGKey(2), (B2, F2), jnp.float32)
    out2 = jax.block_until_ready(critic_net_forward(states2, *params2))
    ref2 = critic_net_reference(states2, *params2)
    assert out2.shape == (B2,), out2.shape
    assert jnp.allclose(out2, ref2, atol=1e-3, rtol=1e-3), (out2, ref2)

    print("KERNEL_OK")
</pallas_src>

<mosaic_0001>
module attributes {stable_mosaic.version = 11 : i64} {
  func.func @_critic_kernel(%arg0: i32, %arg1: memref<128x128xf32, #tpu.memory_space<vmem>>, %arg2: memref<128x256xf32, #tpu.memory_space<vmem>>, %arg3: memref<1x256xf32, #tpu.memory_space<vmem>>, %arg4: memref<256x256xf32, #tpu.memory_space<vmem>>, %arg5: memref<1x256xf32, #tpu.memory_space<vmem>>, %arg6: memref<256x1xf32, #tpu.memory_space<vmem>>, %arg7: memref<1xf32, #tpu.memory_space<smem>>, %arg8: memref<128x1xf32, #tpu.memory_space<vmem>>) attributes {dimension_semantics = [#tpu.dimension_semantics<parallel>], iteration_bounds = array<i64: 2>, scalar_prefetch = 0 : i64, scratch_operands = 0 : i64, tpu.core_type = #tpu.core_type<tc>, window_params = [{transform_indices = @transform_0, window_bounds = array<i64: 128, 128>}, {pipeline_mode = #tpu.pipeline_mode<synchronous>, transform_indices = @transform_1, window_bounds = array<i64: 128, 256>}, {pipeline_mode = #tpu.pipeline_mode<synchronous>, transform_indices = @transform_2, window_bounds = array<i64: 1, 256>}, {pipeline_mode = #tpu.pipeline_mode<synchronous>, transform_indices = @transform_3, window_bounds = array<i64: 256, 256>}, {pipeline_mode = #tpu.pipeline_mode<synchronous>, transform_indices = @transform_4, window_bounds = array<i64: 1, 256>}, {pipeline_mode = #tpu.pipeline_mode<synchronous>, transform_indices = @transform_5, window_bounds = array<i64: 256, 1>}, {transform_indices = @transform_6, window_bounds = array<i64: 1>}, {transform_indices = @transform_7, window_bounds = array<i64: 128, 1>}]} {
    %c0 = arith.constant 0 : index
    %c0_0 = arith.constant 0 : index
    %0 = vector.load %arg1[%c0, %c0_0] : memref<128x128xf32, #tpu.memory_space<vmem>>, vector<128x128xf32>
    %c0_1 = arith.constant 0 : index
    %c0_2 = arith.constant 0 : index
    %1 = vector.load %arg2[%c0_1, %c0_2] : memref<128x256xf32, #tpu.memory_space<vmem>>, vector<128x256xf32>
    %cst = arith.constant dense<0.000000e+00> : vector<128x256xf32>
    %2 = tpu.matmul %0, %1, %cst {dimension_numbers = #tpu.dot_dimension_numbers<[1], [0], [0], [1], [0, 0, 1, 1], [], []>} : vector<128x128xf32>, vector<128x256xf32>, vector<128x256xf32> -> vector<128x256xf32>
    %c0_3 = arith.constant 0 : index
    %c0_4 = arith.constant 0 : index
    %3 = vector.load %arg3[%c0_3, %c0_4] : memref<1x256xf32, #tpu.memory_space<vmem>>, vector<1x256xf32>
    %4 = vector.broadcast %3 : vector<1x256xf32> to vector<128x256xf32>
    %5 = arith.addf %2, %4 : vector<128x256xf32>
    %cst_5 = arith.constant 0.000000e+00 : f32
    %6 = vector.broadcast %cst_5 : f32 to vector<128x256xf32>
    %7 = arith.maximumf %5, %6 : vector<128x256xf32>
    %c0_6 = arith.constant 0 : index
    %c0_7 = arith.constant 0 : index
    %8 = vector.load %arg4[%c0_6, %c0_7] : memref<256x256xf32, #tpu.memory_space<vmem>>, vector<256x256xf32>
    %cst_8 = arith.constant dense<0.000000e+00> : vector<128x256xf32>
    %9 = tpu.matmul %7, %8, %cst_8 {dimension_numbers = #tpu.dot_dimension_numbers<[1], [0], [0], [1], [0, 0, 1, 1], [], []>} : vector<128x256xf32>, vector<256x256xf32>, vector<128x256xf32> -> vector<128x256xf32>
    %c0_9 = arith.constant 0 : index
    %c0_10 = arith.constant 0 : index
    %10 = vector.load %arg5[%c0_9, %c0_10] : memref<1x256xf32, #tpu.memory_space<vmem>>, vector<1x256xf32>
    %11 = vector.broadcast %10 : vector<1x256xf32> to vector<128x256xf32>
    %12 = arith.addf %9, %11 : vector<128x256xf32>
    %cst_11 = arith.constant 0.000000e+00 : f32
    %13 = vector.broadcast %cst_11 : f32 to vector<128x256xf32>
    %14 = arith.maximumf %12, %13 : vector<128x256xf32>
    %c0_12 = arith.constant 0 : index
    %c0_13 = arith.constant 0 : index
    %15 = vector.load %arg6[%c0_12, %c0_13] : memref<256x1xf32, #tpu.memory_space<vmem>>, vector<256x1xf32>
    %cst_14 = arith.constant dense<0.000000e+00> : vector<128x1xf32>
    %16 = tpu.matmul %14, %15, %cst_14 {dimension_numbers = #tpu.dot_dimension_numbers<[1], [0], [0], [1], [0, 0, 1, 1], [], []>} : vector<128x256xf32>, vector<256x1xf32>, vector<128x1xf32> -> vector<128x1xf32>
    %c0_15 = arith.constant 0 : index
    %17 = memref.load %arg7[%c0_15] : memref<1xf32, #tpu.memory_space<smem>>
    %18 = vector.broadcast %17 : f32 to vector<128x1xf32>
    %19 = arith.addf %16, %18 : vector<128x1xf32>
    %c0_16 = arith.constant 0 : index
    %c0_17 = arith.constant 0 : index
    %20 = vector.load %arg8[%c0_16, %c0_17] : memref<128x1xf32, #tpu.memory_space<vmem>>, vector<128x1xf32>
    tpu.vector_store %arg8[%c0_16, %c0_17], %19 {strides = array<i32>} : memref<128x1xf32, #tpu.memory_space<vmem>>, vector<128x1xf32>,
    return
  }
  func.func @transform_0(%arg0: i32) -> (i32, i32) {
    %c0_i32 = arith.constant 0 : i32
    %c0_i32_0 = arith.constant 0 : i32
    return %arg0, %c0_i32 : i32, i32
  }
  func.func @transform_1(%arg0: i32) -> (i32, i32) {
    %c0_i32 = arith.constant 0 : i32
    %c0_i32_0 = arith.constant 0 : i32
    %c0_i32_1 = arith.constant 0 : i32
    return %c0_i32, %c0_i32_0 : i32, i32
  }
  func.func @transform_2(%arg0: i32) -> (i32, i32) {
    %c0_i32 = arith.constant 0 : i32
    %c0_i32_0 = arith.constant 0 : i32
    %c0_i32_1 = arith.constant 0 : i32
    return %c0_i32, %c0_i32_0 : i32, i32
  }
  func.func @transform_3(%arg0: i32) -> (i32, i32) {
    %c0_i32 = arith.constant 0 : i32
    %c0_i32_0 = arith.constant 0 : i32
    %c0_i32_1 = arith.constant 0 : i32
    return %c0_i32, %c0_i32_0 : i32, i32
  }
  func.func @transform_4(%arg0: i32) -> (i32, i32) {
    %c0_i32 = arith.constant 0 : i32
    %c0_i32_0 = arith.constant 0 : i32
    %c0_i32_1 = arith.constant 0 : i32
    return %c0_i32, %c0_i32_0 : i32, i32
  }
  func.func @transform_5(%arg0: i32) -> (i32, i32) {
    %c0_i32 = arith.constant 0 : i32
    %c0_i32_0 = arith.constant 0 : i32
    %c0_i32_1 = arith.constant 0 : i32
    return %c0_i32, %c0_i32_0 : i32, i32
  }
  func.func @transform_6(%arg0: i32) -> i32 {
    %c0_i32 = arith.constant 0 : i32
    %c0_i32_0 = arith.constant 0 : i32
    return %c0_i32 : i32
  }
  func.func @transform_7(%arg0: i32) -> (i32, i32) {
    %c0_i32 = arith.constant 0 : i32
    %c0_i32_0 = arith.constant 0 : i32
    return %arg0, %c0_i32 : i32, i32
  }
}

</mosaic_0001>

<bundles_post_ra>
// kernel: _critic_forward.1
= control target key start
LH: loop header
LB: loop body
LE: loop exit
PB: predicated region body
PF: predicated region fallthrough
CT: control target
= control target key end

     0   :  { %s2329_s0 = inlined_call_operand.hbm [shape: f32[200,128], index: 0, kind: input, shape index: {}]   ;;  %s2330_s1 = inlined_call_operand.vmem [shape: f32[128,256], index: 1, kind: input, shape index: {}]   ;;  %s2331_s2 = inlined_call_operand.vmem [shape: f32[1,256], index: 2, kind: input, shape index: {}]   ;;  %s2332_s3 = inlined_call_operand.hbm [shape: f32[256,256], index: 3, kind: input, shape index: {}]   ;;  %s2333_s4 = inlined_call_operand.vmem [shape: f32[1,256], index: 4, kind: input, shape index: {}]   ;;  %s2334_s5 = inlined_call_operand.vmem [shape: f32[256,1], index: 5, kind: input, shape index: {}]   ;;  %s2335_s6 = inlined_call_operand.<no memory space> [shape: f32[1], index: 6, kind: input, shape index: {}]   ;;  %s2336_s7 = inlined_call_operand.vmem [shape: f32[200,1], index: 7, kind: output, shape index: {}]  }
   0x1   :  { %12 = sst [smem:[#allocation2]] %s2335_s6 }
   0x2   :  { %13 = vsyncpa [#allocation4], 0 }
   0x3   :  { %15 = vsyncpa [#allocation4 + $0x1], 0 }
   0x4   :  { %16 = vsyncpa [#allocation6], 0  ;;  %s1756_s26 = smov 0   ;;  %s1758_s27 = smov 0  }
   0x5   :  { %s1760_s28 = smov 0   ;;  %s1762_s29 = smov 0  }
   0x6 LB: > { %s1775_s6 = sadd.s32 4294967295, %s1673_s29   ;;  %s1778_s30 = sadd.s32 1, %s1673_s29   ;;  %s1673_s29 = sphi %s1762_s29, %s2353_s29   ;;  %s1669_s28 = sphi %s1760_s28, %s2352_s28   ;;  %s1665_s27 = sphi %s1758_s27, %s2351_s27   ;;  %s1661_s26 = sphi %s1756_s26, %s2350_s26  }
   0x7   : > { %s26_s8 = ssub.s32 %s1673_s29, %s1778_s30  ;;  %s29_s9 = sadd.s32 1, %s1669_s28 }
   0x8   : > { %p27_p0 = scmp.eq.s32.totalorder %s26_s8, 0  ;;  %p36_p1 = scmp.ne.s32.totalorder %s1669_s28, %s1665_s27 }
   0x9   : > { %p37_p2 = scmp.eq.s32.totalorder %s1673_s29, 0  ;;  %p42_p3 = scmp.ne.s32.totalorder %s1665_s27, %s1661_s26 }
   0xa   : > { %s1788_s10 = scalar_select %p27_p0, %s1669_s28, %s29_s9  }
   0xb   : > { %p1790_p4 = por %p37_p2, %p36_p1  ;;  %p2337_p5 = scmp.eq.s32.totalorder %s1775_s6, 0 }
   0xc   : > { %p192_p6 = scmp.eq.s32.totalorder %s1775_s6, 1  ;;  %p1387_p7 = scmp.ge.s32.totalorder %s1673_s29, 1 }
   0xd   : > { %p1799_p8 = por %p2337_p5, %p42_p3  ;;  %p205_p9 = scmp.lt.s32.totalorder %s1673_s29, 3 }
   0xe   : > { %p1804_p10 = por %p192_p6, %p36_p1  ;;  %s222_s17 = sshll.u32 %s2332_s3, 4  ;;  %s223_s17 = int_to_ptr.hbm [resolvable:$true] %s222_s17 }
   0xf   : > { %p1808_p11 = pnand %p1387_p7, %p205_p9  ;;  %s1707_s18 = smov [#allocation5]  }
  0x10   : > { %s224_s19 = sshll.u32 %s1707_s18, 4  ;;  %s1708_s20 = smov 256   ;;  %s225_s19 = int_to_ptr.vmem [resolvable:$true] %s224_s19 }
  0x11   : > { %p1427_p12 = pneg %p1808_p11  ;;  %s1709_s21 = smov 16  }
  0x12   : > { %p1389_p0 = scmp.ge.s32.totalorder %s1673_s29, 2 }
  0x13   : > { %p1428_p13 = pnand %p1427_p12, %p2337_p5 }
  0x14   : > { %243 = sbr.rel (%p1389_p0) target bundleno = 61 (0x3d), region = 40 }
  0x15   : > { %1430 = dma.hbm_to_vmem [thread:$0]  (!%p1428_p13), %s223_s17, 8192, %s225_s19, [#allocation6], %s1708_s20, %s1708_s20, %s1709_s21  }
  0x19   : > { %246 = sbr.rel (!%p1790_p4) target bundleno = 61 (0x3d), region = 44  ;;  %s247_s22 = sand.u32 (%p1790_p4), 1, %s1669_s28  }
  0x1a   : > { %s1391_s23 = sshll.u32 (%p1790_p4), %s1673_s29, 4  ;;  %s1390_s24 = sshll.u32 (%p1790_p4), %s247_s22, 7 }
  0x1b   : > { %s253_s25 = ssub.s32 (%p1790_p4), 25, %s1391_s23  ;;  %s1827_s15 = scalar_lea.sflag (%p1790_p4), [#allocation4], %s247_s22 }
  0x1c   : > { %p254_p1 = scmp.lt.s32.totalorder (%p1790_p4), %s253_s25, 16  ;;  %s251_s16 = scalar_lea.vmem (%p1790_p4), [#allocation3], %s1390_s24 }
  0x1e   : > { %s2355_s25 = smov (!%p254_p1, %s253_s25), 16 }
  0x1f   : > { %s1392_s26 = sshll.u32 %s2355_s25, 3 }
  0x20   : > { %s257_s8 = ssub.s32 128, %s1392_s26 }
  0x21   : > { %s258_s9 = sshll.u32 %s257_s8, 4 }
  0x22   : > { %259 = vsyncadd %s1827_s15, %s258_s9  ;;  %p1830_p2 = scmp.ne.s32.totalorder %s1392_s26, 0  ;;  %s1418_s17 = sshll.u32 %s1673_s29, 7 }
  0x23   : > { %s262_s20 = scalar_lea.hbm %s2329_s0, %s1418_s17  ;;  %s1838_s21 = sshll.u32 %s251_s16, 4  ;;  %s267_s21 = int_to_ptr.vmem [resolvable:$true] %s1838_s21 }
  0x24   : > { %s264_s22 = sshll.u32 %s262_s20, 4  ;;  %s1396_s23 = sshll.u32 %s2355_s25, 7  ;;  %s1841_s22 = int_to_ptr.hbm [resolvable:$true] %s264_s22 }
  0x25   : > { %s1564_s24 = sshra.s32 %s1841_s22, 4  ;;  %s1566_s26 = sshrl.u32 %s1396_s23, 4  ;;  %s1565_s24 = int_to_ptr.hbm [resolvable:$true] %s1564_s24 }
  0x26   : > { %s1571_s8 = scalar_lea.hbm %s1565_s24, %s1566_s26  ;;  %s1575_s16 = scalar_lea.hbm %s2329_s0, 200 }
  0x27   : > { %p1572_p3 = scmp.ne.s32.totalorder %s1565_s24, %s1571_s8  ;;  %p1576_p7 = scmp.lt.s32.totalorder %s1565_s24, %s2329_s0 }
  0x28   : > { %p1577_p9 = scmp.lt.s32.totalorder %s1575_s16, %s1571_s8 }
  0x29   : > { %p1573_p4 = pnand %p1572_p3, %p1830_p2 }
  0x2a   : > { %p1578_p12 = por %p1577_p9, %p1576_p7 }
  0x2b   : > { %p1574_p6 = pneg %p1573_p4 }
  0x2d   : > { %p1579_p13 = pnand %p1578_p12, %p1574_p6 }
  0x2f   : > { %1582 = shalt.err (!%p1579_p13)
}
  0x30   : > { %s1583_s19 = sshra.s32 %s267_s21, 4  ;;  %s1710_s29 = smov [#allocation3]   ;;  %s1584_s19 = int_to_ptr.vmem [resolvable:$true] %s1583_s19 }
  0x31   : > { %s1590_s20 = scalar_lea.vmem %s1584_s19, %s1566_s26  ;;  %s1594_s9 = scalar_lea.vmem %s1710_s29, 256 }
  0x32   : > { %p1591_p0 = scmp.ne.s32.totalorder %s1584_s19, %s1590_s20  ;;  %p1596_p4 = scmp.lt.s32.totalorder %s1594_s9, %s1590_s20 }
  0x34   : > { %p1592_p1 = pnand %p1591_p0, %p1830_p2 }
  0x36   : > { %p1593_p3 = pneg %p1592_p1 }
  0x38   : > { %p1598_p5 = pnand %p1596_p4, %p1593_p3 }
  0x3a   : > { %1601 = shalt.err (!%p1598_p5)
}
  0x3b   : > { %s1711_s24 = smov 128   ;;  %s1712_s8 = smov 8  }
  0x3c   : > { %272 = dma.hbm_to_vmem [thread:$0]  (%p1830_p2), %s1841_s22, %s1396_s23, %s267_s21, %s1827_s15, %s1711_s24, %s1711_s24, %s1712_s8  }
  0x3d PF: > { %278 = sbr.rel (%p1808_p11) target bundleno = 675 (0x2a3), region = 48  ;;  %s280_s26 = sand.u32 (!%p1808_p11), 1, %s1665_s27  }
  0x3e   : > { %s1870_s16 = sshll.u32 (!%p1808_p11), %s280_s26, 7  ;;  %s281_s17 = scalar_lea.sflag (!%p1808_p11), [#allocation4], %s280_s26 }
  0x3f   : > { %s1873_s18 = scalar_lea.vmem (!%p1808_p11), [#allocation3], %s1870_s16 }
  0x42   : > { %1652 = dma.done.wait (%p1799_p8), %s281_s17, 2048  }
  0x43   : > { %1654 = vsyncadd (%p1799_p8), %s281_s17, 4294965248  ;;  %p2343_p5 = scmp.eq.s32.totalorder %s1775_s6, 0 }
  0x45   : > { %1656 = dma.done.wait (%p2343_p5), [#allocation6], 8192   ;;  %p2344_p2 = pmov %p2343_p5 }
  0x46   : > { %v376_v0 = vld [vmem:[%s2330_s1 + $0xf0] sm:$0xff]  ;;  %v374_v1 = vld [vmem:[%s2330_s1 + $0xe0] sm:$0xff]  ;;  %v377_v2 = vld [vmem:[%s2330_s1 + $0xf8] sm:$0xff]  ;;  %s940_s14 = sld [smem:[#allocation2]]  ;;  %vm1072_vm0 = vcmask 7168   ;;  %s2173_s25 = scalar_lea.vmem [#allocation7], %s1870_s16  }
  0x47   : > { %1658 = vsyncadd (%p2344_p2), [#allocation6], 4294959104  ;;  %384 = vmatpush.msra.mxu0 %v376_v0  ;;  %449 = vmatpush.msra.mxu1 %v377_v2  ;;  %v375_v3 = vld [vmem:[%s2330_s1 + $0xe8] sm:$0xff]  ;;  %v372_v4 = vld [vmem:[%s2330_s1 + $0xd0] sm:$0xff]  ;;  %s1402_s16 = sshll.u32 (%p1804_p10), %s1775_s6, 4  ;;  %s1419_s15 = sshll.u32 (%p1804_p10), %s1775_s6, 7 }
  0x48   : > { %v373_v5 = vld [vmem:[%s2330_s1 + $0xd8] sm:$0xff]  ;;  %v370_v6 = vld [vmem:[%s2330_s1 + $0xc0] sm:$0xff]  ;;  %v371_v7 = vld [vmem:[%s2330_s1 + $0xc8] sm:$0xff]  ;;  %s1097_s11 = ssub.s32 (%p1804_p10), 25, %s1402_s16  ;;  %s2229_s12 = scalar_lea.vmem (%p1804_p10), %s2336_s7, %s1419_s15  }
  0x49   : > { %385 = vmatpush.msra.mxu0 %v374_v1  ;;  %450 = vmatpush.msra.mxu1 %v375_v3  ;;  %v368_v8 = vld [vmem:[%s2330_s1 + $0xb0] sm:$0xff]  ;;  %v369_v9 = vld [vmem:[%s2330_s1 + $0xb8] sm:$0xff]  ;;  %v366_v10 = vld [vmem:[%s2330_s1 + $0xa0] sm:$0xff]  ;;  %p1098_p8 = scmp.lt.s32.totalorder (%p1804_p10), %s1097_s11, 16 }
  0x4a   : > { %v367_v11 = vld [vmem:[%s2330_s1 + $0xa8] sm:$0xff]  ;;  %v364_v12 = vld [vmem:[%s2330_s1 + $0x90] sm:$0xff]  ;;  %v365_v13 = vld [vmem:[%s2330_s1 + $0x98] sm:$0xff] }
  0x4b   : > { %386 = vmatpush.msra.mxu0 %v372_v4  ;;  %451 = vmatpush.msra.mxu1 %v373_v5  ;;  %v362_v14 = vld [vmem:[%s2330_s1 + $0x80] sm:$0xff]  ;;  %v363_v15 = vld [vmem:[%s2330_s1 + $0x88] sm:$0xff]  ;;  %v360_v16 = vld [vmem:[%s2330_s1 + $0x70] sm:$0xff] }
  0x4c   : > { %v361_v17 = vld [vmem:[%s2330_s1 + $0x78] sm:$0xff]  ;;  %v358_v18 = vld [vmem:[%s2330_s1 + $0x60] sm:$0xff]  ;;  %v359_v19 = vld [vmem:[%s2330_s1 + $0x68] sm:$0xff] }
  0x4d   : > { %387 = vmatpush.msra.mxu0 %v370_v6  ;;  %452 = vmatpush.msra.mxu1 %v371_v7  ;;  %v356_v20 = vld [vmem:[%s2330_s1 + $0x50] sm:$0xff]  ;;  %v357_v21 = vld [vmem:[%s2330_s1 + $0x58] sm:$0xff]  ;;  %v354_v22 = vld [vmem:[%s2330_s1 + $0x40] sm:$0xff] }
  0x4e   : > { %v355_v23 = vld [vmem:[%s2330_s1 + $0x48] sm:$0xff]  ;;  %v352_v24 = vld [vmem:[%s2330_s1 + $0x30] sm:$0xff]  ;;  %v353_v25 = vld [vmem:[%s2330_s1 + $0x38] sm:$0xff] }
  0x4f   : > { %388 = vmatpush.msra.mxu0 %v368_v8  ;;  %453 = vmatpush.msra.mxu1 %v369_v9  ;;  %v350_v26 = vld [vmem:[%s2330_s1 + $0x20] sm:$0xff]  ;;  %v351_v27 = vld [vmem:[%s2330_s1 + $0x28] sm:$0xff]  ;;  %v348_v28 = vld [vmem:[%s2330_s1 + $0x10] sm:$0xff] }
  0x50   : > { %v349_v29 = vld [vmem:[%s2330_s1 + $0x18] sm:$0xff]  ;;  %v346_v30 = vld [vmem:[%s2330_s1] sm:$0xff]  ;;  %v347_v31 = vld [vmem:[%s2330_s1 + $0x8] sm:$0xff] }
  0x51   : > { %389 = vmatpush.msra.mxu0 %v366_v10  ;;  %454 = vmatpush.msra.mxu1 %v367_v11  ;;  %v330_v32 = vld [vmem:[%s1873_s18] sm:$0xff]  ;;  %v577_v33 = vld [vmem:[#allocation5 + $0xf8] sm:$0xff]  ;;  %v575_v35 = vld [vmem:[#allocation5 + $0xe8] sm:$0xff] }
  0x52   : > { %v609_v34 = vld [vmem:[#allocation5 + $0x1f8] sm:$0xff]  ;;  %v607_v36 = vld [vmem:[#allocation5 + $0x1e8] sm:$0xff]  ;;  %v332_v44 = vld [vmem:[%s1873_s18 + $0x10] sm:$0xff] }
  0x53   : > { %390 = vmatpush.msra.mxu0 %v364_v12  ;;  %455 = vmatpush.msra.mxu1 %v365_v13  ;;  %v573_v37 = vld [vmem:[#allocation5 + $0xd8] sm:$0xff]  ;;  %v571_v39 = vld [vmem:[#allocation5 + $0xc8] sm:$0xff]  ;;  %v334_v50 = vld [vmem:[%s1873_s18 + $0x20] sm:$0xff] }
  0x54   : > { %v605_v38 = vld [vmem:[#allocation5 + $0x1d8] sm:$0xff]  ;;  %v603_v40 = vld [vmem:[#allocation5 + $0x1c8] sm:$0xff]  ;;  %v336_v56 = vld [vmem:[%s1873_s18 + $0x30] sm:$0xff] }
  0x55   : > { %391 = vmatpush.msra.mxu0 %v362_v14  ;;  %456 = vmatpush.msra.mxu1 %v363_v15  ;;  %v331_v41 = vld [vmem:[%s1873_s18 + $0x8] sm:$0xff]  ;;  %v569_v42 = vld [vmem:[#allocation5 + $0xb8] sm:$0xff]  ;;  %v338_v62 = vld [vmem:[%s1873_s18 + $0x40] sm:$0xff] }
  0x56   : > { %v601_v43 = vld [vmem:[#allocation5 + $0x1b8] sm:$0xff]  ;;  %v567_v45 = vld [vmem:[#allocation5 + $0xa8] sm:$0xff]  ;;  %v576_v0 = vld [vmem:[#allocation5 + $0xf0] sm:$0xff] }
  0x57   : > { %392 = vmatpush.msra.mxu0 %v360_v16  ;;  %457 = vmatpush.msra.mxu1 %v361_v17  ;;  %v599_v46 = vld [vmem:[#allocation5 + $0x1a8] sm:$0xff]  ;;  %v333_v47 = vld [vmem:[%s1873_s18 + $0x18] sm:$0xff]  ;;  %v574_v2 = vld [vmem:[#allocation5 + $0xe0] sm:$0xff] }
  0x58   : > { %v565_v48 = vld [vmem:[#allocation5 + $0x98] sm:$0xff]  ;;  %v563_v51 = vld [vmem:[#allocation5 + $0x88] sm:$0xff]  ;;  %616 = vmatpush.msra.mxu2 %v576_v0  ;;  %v608_v3 = vld [vmem:[#allocation5 + $0x1f0] sm:$0xff] }
  0x59   : > { %393 = vmatpush.msra.mxu0 %v358_v18  ;;  %458 = vmatpush.msra.mxu1 %v359_v19  ;;  %v597_v49 = vld [vmem:[#allocation5 + $0x198] sm:$0xff]  ;;  %v595_v52 = vld [vmem:[#allocation5 + $0x188] sm:$0xff]  ;;  %v572_v4 = vld [vmem:[#allocation5 + $0xd0] sm:$0xff] }
  0x5a   : > { %v335_v53 = vld [vmem:[%s1873_s18 + $0x28] sm:$0xff]  ;;  %v561_v54 = vld [vmem:[#allocation5 + $0x78] sm:$0xff]  ;;  %681 = vmatpush.msra.mxu3 %v608_v3  ;;  %v606_v5 = vld [vmem:[#allocation5 + $0x1e0] sm:$0xff]  ;;  %617 = vmatpush.msra.mxu2 %v574_v2 }
  0x5b   : > { %394 = vmatpush.msra.mxu0 %v356_v20  ;;  %459 = vmatpush.msra.mxu1 %v357_v21  ;;  %v593_v55 = vld [vmem:[#allocation5 + $0x178] sm:$0xff]  ;;  %v559_v57 = vld [vmem:[#allocation5 + $0x68] sm:$0xff]  ;;  %v570_v7 = vld [vmem:[#allocation5 + $0xc0] sm:$0xff] }
  0x5c   : > { %v591_v58 = vld [vmem:[#allocation5 + $0x168] sm:$0xff]  ;;  %v337_v59 = vld [vmem:[%s1873_s18 + $0x38] sm:$0xff]  ;;  %682 = vmatpush.msra.mxu3 %v606_v5  ;;  %618 = vmatpush.msra.mxu2 %v572_v4  ;;  %v604_v8 = vld [vmem:[#allocation5 + $0x1d0] sm:$0xff] }
  0x5d   : > { %395 = vmatpush.msra.mxu0 %v354_v22  ;;  %460 = vmatpush.msra.mxu1 %v355_v23  ;;  %v557_v60 = vld [vmem:[#allocation5 + $0x58] sm:$0xff]  ;;  %v555_v63 = vld [vmem:[#allocation5 + $0x48] sm:$0xff]  ;;  %v568_v10 = vld [vmem:[#allocation5 + $0xb0] sm:$0xff] }
  0x5e   : > { %v589_v61 = vld [vmem:[#allocation5 + $0x158] sm:$0xff]  ;;  %v587_v1 = vld [vmem:[#allocation5 + $0x148] sm:$0xff]  ;;  %619 = vmatpush.msra.mxu2 %v570_v7  ;;  %683 = vmatpush.msra.mxu3 %v604_v8  ;;  %v602_v11 = vld [vmem:[#allocation5 + $0x1c0] sm:$0xff] }
  0x5f   : > { %396 = vmatpush.msra.mxu0 %v352_v24  ;;  %461 = vmatpush.msra.mxu1 %v353_v25  ;;  %v339_v6 = vld [vmem:[%s1873_s18 + $0x48] sm:$0xff]  ;;  %v553_v9 = vld [vmem:[#allocation5 + $0x38] sm:$0xff]  ;;  %v566_v13 = vld [vmem:[#allocation5 + $0xa0] sm:$0xff] }
  0x60   : > { %v585_v12 = vld [vmem:[#allocation5 + $0x138] sm:$0xff]  ;;  %v600_v14 = vld [vmem:[#allocation5 + $0x1b0] sm:$0xff]  ;;  %620 = vmatpush.msra.mxu2 %v568_v10  ;;  %684 = vmatpush.msra.mxu3 %v602_v11  ;;  %v598_v16 = vld [vmem:[#allocation5 + $0x1a0] sm:$0xff] }
  0x61   : > { %397 = vmatpush.msra.mxu0 %v350_v26  ;;  %462 = vmatpush.msra.mxu1 %v351_v27  ;;  %v564_v15 = vld [vmem:[#allocation5 + $0x90] sm:$0xff]  ;;  %v562_v18 = vld [vmem:[#allocation5 + $0x80] sm:$0xff]  ;;  %v551_v20 = vld [vmem:[#allocation5 + $0x28] sm:$0xff] }
  0x62   : > { %v340_v17 = vld [vmem:[%s1873_s18 + $0x50] sm:$0xff]  ;;  %621 = vmatpush.msra.mxu2 %v566_v13  ;;  %685 = vmatpush.msra.mxu3 %v600_v14  ;;  %v594_v22 = vld [vmem:[#allocation5 + $0x180] sm:$0xff]  ;;  %v583_v23 = vld [vmem:[#allocation5 + $0x128] sm:$0xff] }
  0x63   : > { %398 = vmatpush.msra.mxu0 %v348_v28  ;;  %463 = vmatpush.msra.mxu1 %v349_v29  ;;  %v596_v19 = vld [vmem:[#allocation5 + $0x190] sm:$0xff]  ;;  %v558_v24 = vld [vmem:[#allocation5 + $0x60] sm:$0xff]  ;;  %v341_v28 = vld [vmem:[%s1873_s18 + $0x58] sm:$0xff] }
  0x64   : > { %622 = vmatpush.msra.mxu2 %v564_v15  ;;  %686 = vmatpush.msra.mxu3 %v598_v16  ;;  %v560_v21 = vld [vmem:[#allocation5 + $0x70] sm:$0xff]  ;;  %v590_v27 = vld [vmem:[#allocation5 + $0x160] sm:$0xff]  ;;  %v919_v7 = vld [vmem:[%s2334_s5 + $0x58] sm:$0xff] }
  0x65   : > { %399 = vmatpush.msra.mxu0 %v346_v30  ;;  %464 = vmatpush.msra.mxu1 %v347_v31  ;;  %v592_v25 = vld [vmem:[#allocation5 + $0x170] sm:$0xff]  ;;  %v554_v29 = vld [vmem:[#allocation5 + $0x40] sm:$0xff]  ;;  %v549_v31 = vld [vmem:[#allocation5 + $0x18] sm:$0xff] }
  0x66   : > { %400 = vmatmul.f32.vlgmr.msra.gmra.mxu0 %v330_v32  ;;  %465 = vmatmul.f32.vlgmr.msra.gmra.mxu1 %v330_v32  ;;  %v556_v26 = vld [vmem:[#allocation5 + $0x50] sm:$0xff]  ;;  %v936_v4 = vld [vmem:[%s2334_s5 + $0xe0] sm:$0xff] }
  0x67   : > { %746 = vmatpush.msrb.mxu0 %v577_v33  ;;  %811 = vmatpush.msrb.mxu1 %v609_v34  ;;  %v588_v30 = vld [vmem:[#allocation5 + $0x150] sm:$0xff]  ;;  %v586_v33 = vld [vmem:[#allocation5 + $0x140] sm:$0xff]  ;;  %v581_v34 = vld [vmem:[#allocation5 + $0x118] sm:$0xff] }
  0x68   : > { %623 = vmatpush.msra.mxu2 %v562_v18  ;;  %687 = vmatpush.msra.mxu3 %v596_v19  ;;  %v552_v32 = vld [vmem:[#allocation5 + $0x30] sm:$0xff] }
  0x69   : > { %747 = vmatpush.msrb.mxu0 %v575_v35  ;;  %812 = vmatpush.msrb.mxu1 %v607_v36  ;;  %v550_v35 = vld [vmem:[#allocation5 + $0x20] sm:$0xff]  ;;  %v584_v36 = vld [vmem:[#allocation5 + $0x130] sm:$0xff] }
  0x6a   : > { %624 = vmatpush.msra.mxu2 %v560_v21  ;;  %688 = vmatpush.msra.mxu3 %v594_v22  ;;  %v918_v15 = vld [vmem:[%s2334_s5 + $0x50] sm:$0xff] }
  0x6b   : > { %748 = vmatpush.msrb.mxu0 %v573_v37  ;;  %813 = vmatpush.msrb.mxu1 %v605_v38  ;;  %v342_v37 = vld [vmem:[%s1873_s18 + $0x60] sm:$0xff]  ;;  %v548_v38 = vld [vmem:[#allocation5 + $0x10] sm:$0xff] }
  0x6c   : > { %625 = vmatpush.msra.mxu2 %v558_v24  ;;  %689 = vmatpush.msra.mxu3 %v592_v25 }
  0x6d   : > { %749 = vmatpush.msrb.mxu0 %v571_v39  ;;  %814 = vmatpush.msrb.mxu1 %v603_v40  ;;  %v582_v39 = vld [vmem:[#allocation5 + $0x120] sm:$0xff] }
  0x6e   : > { %403 = vmatmul.f32.gmra.mxu0 %v331_v41  ;;  %468 = vmatmul.f32.gmra.mxu1 %v331_v41  ;;  %v546_v40 = vld [vmem:[#allocation5] sm:$0xff]  ;;  %v580_v41 = vld [vmem:[#allocation5 + $0x110] sm:$0xff] }
  0x6f   : > { %750 = vmatpush.msrb.mxu0 %v569_v42  ;;  %815 = vmatpush.msrb.mxu1 %v601_v43  ;;  %v547_v42 = vld [vmem:[#allocation5 + $0x8] sm:$0xff]  ;;  %v578_v43 = vld [vmem:[#allocation5 + $0x100] sm:$0xff] }
  0x70   : > { %626 = vmatpush.msra.mxu2 %v556_v26  ;;  %690 = vmatpush.msra.mxu3 %v590_v27 }
  0x71   : > { %751 = vmatpush.msrb.mxu0 %v567_v45  ;;  %816 = vmatpush.msrb.mxu1 %v599_v46  ;;  %v343_v45 = vld [vmem:[%s1873_s18 + $0x68] sm:$0xff]  ;;  %v923_v46 = vld [vmem:[%s2334_s5 + $0x78] sm:$0xff] }
  0x72   : > { %627 = vmatpush.msra.mxu2 %v554_v29  ;;  %691 = vmatpush.msra.mxu3 %v588_v30  ;;  %v933_v30 = vld [vmem:[%s2334_s5 + $0xc8] sm:$0xff] }
  0x73   : > { %752 = vmatpush.msrb.mxu0 %v565_v48  ;;  %817 = vmatpush.msrb.mxu1 %v597_v49  ;;  %v939_v48 = vld [vmem:[%s2334_s5 + $0xf8] sm:$0xff]  ;;  %v922_v49 = vld [vmem:[%s2334_s5 + $0x70] sm:$0xff] }
  0x74   : > { %628 = vmatpush.msra.mxu2 %v552_v32  ;;  %692 = vmatpush.msra.mxu3 %v586_v33 }
  0x75   : > { %753 = vmatpush.msrb.mxu0 %v563_v51  ;;  %818 = vmatpush.msrb.mxu1 %v595_v52  ;;  %v938_v51 = vld [vmem:[%s2334_s5 + $0xf0] sm:$0xff]  ;;  %v378_v52 = vld [vmem:[%s2331_s2] sm:$0x3] }
  0x76   : > { %406 = vmatmul.f32.gmra.mxu0 %v332_v44  ;;  %471 = vmatmul.f32.gmra.mxu1 %v332_v44  ;;  %v579_v44 = vld [vmem:[#allocation5 + $0x108] sm:$0xff] }
  0x77   : > { %754 = vmatpush.msrb.mxu0 %v561_v54  ;;  %819 = vmatpush.msrb.mxu1 %v593_v55  ;;  %v2012_v54 = vperm.slane %v378_v52, 1  ;;  %v921_v55 = vld [vmem:[%s2334_s5 + $0x68] sm:$0xff] }
  0x78   : > { %629 = vmatpush.msra.mxu2 %v550_v35  ;;  %693 = vmatpush.msra.mxu3 %v584_v36 }
  0x79   : > { %755 = vmatpush.msrb.mxu0 %v559_v57  ;;  %820 = vmatpush.msrb.mxu1 %v591_v58 }
  0x7a   : > { %630 = vmatpush.msra.mxu2 %v548_v38  ;;  %694 = vmatpush.msra.mxu3 %v582_v39  ;;  %v932_v38 = vld [vmem:[%s2334_s5 + $0xc0] sm:$0xff]  ;;  %v915_v39 = vld [vmem:[%s2334_s5 + $0x38] sm:$0xff] }
  0x7b   : > { %756 = vmatpush.msrb.mxu0 %v557_v60  ;;  %821 = vmatpush.msrb.mxu1 %v589_v61  ;;  %v937_v60 = vld [vmem:[%s2334_s5 + $0xe8] sm:$0xff] }
  0x7c   : > { %631 = vmatpush.msra.mxu2 %v546_v40  ;;  %695 = vmatpush.msra.mxu3 %v580_v41 }
  0x7d   : > { %757 = vmatpush.msrb.mxu0 %v555_v63  ;;  %822 = vmatpush.msrb.mxu1 %v587_v1  ;;  %v920_v63 = vld [vmem:[%s2334_s5 + $0x60] sm:$0xff] }
  0x7e   : > { %409 = vmatmul.f32.gmra.mxu0 %v333_v47  ;;  %474 = vmatmul.f32.gmra.mxu1 %v333_v47  ;;  %v344_v47 = vld [vmem:[%s1873_s18 + $0x70] sm:$0xff] }
  0x7f   : > { %758 = vmatpush.msrb.mxu0 %v553_v9  ;;  %823 = vmatpush.msrb.mxu1 %v585_v12  ;;  %v935_v12 = vld [vmem:[%s2334_s5 + $0xd8] sm:$0xff] }
  0x80   : > { %696 = vmatpush.msra.mxu3 %v578_v43  ;;  %942 = vmatpush.msrb.mxu2 %v923_v46  ;;  %v931_v46 = vld [vmem:[%s2334_s5 + $0xb8] sm:$0xff] }
  0x81   : > { %759 = vmatpush.msrb.mxu0 %v551_v20  ;;  %824 = vmatpush.msrb.mxu1 %v583_v23  ;;  %v934_v20 = vld [vmem:[%s2334_s5 + $0xd0] sm:$0xff]  ;;  %v917_v23 = vld [vmem:[%s2334_s5 + $0x48] sm:$0xff] }
  0x82   : > { %1007 = vmatpush.msrb.mxu3 %v939_v48  ;;  %943 = vmatpush.msrb.mxu2 %v922_v49 }
  0x83   : > { %760 = vmatpush.msrb.mxu0 %v549_v31  ;;  %825 = vmatpush.msrb.mxu1 %v581_v34  ;;  %v916_v31 = vld [vmem:[%s2334_s5 + $0x40] sm:$0xff] }
  0x84   : > { %1008 = vmatpush.msrb.mxu3 %v938_v51  ;;  %944 = vmatpush.msrb.mxu2 %v921_v55 }
  0x85   : > { %761 = vmatpush.msrb.mxu0 %v547_v42  ;;  %826 = vmatpush.msrb.mxu1 %v579_v44 }
  0x86   : > { %412 = vmatmul.f32.gmra.mxu0 %v334_v50  ;;  %477 = vmatmul.f32.gmra.mxu1 %v334_v50  ;;  %v345_v50 = vld [vmem:[%s1873_s18 + $0x78] sm:$0xff] }
  0x87   : > { %1009 = vmatpush.msrb.mxu3 %v937_v60  ;;  %945 = vmatpush.msrb.mxu2 %v920_v63 }
  0x89   : > { %1010 = vmatpush.msrb.mxu3 %v936_v4  ;;  %946 = vmatpush.msrb.mxu2 %v919_v7 }
  0x8b   : > { %1011 = vmatpush.msrb.mxu3 %v935_v12  ;;  %947 = vmatpush.msrb.mxu2 %v918_v15 }
  0x8d   : > { %1012 = vmatpush.msrb.mxu3 %v934_v20  ;;  %948 = vmatpush.msrb.mxu2 %v917_v23 }
  0x8e   : > { %415 = vmatmul.f32.gmra.mxu0 %v335_v53  ;;  %480 = vmatmul.f32.gmra.mxu1 %v335_v53  ;;  %v2010_v53 = vperm.slane %v378_v52, 0 }
  0x8f   : > { %1013 = vmatpush.msrb.mxu3 %v933_v30  ;;  %949 = vmatpush.msrb.mxu2 %v916_v31 }
  0x91   : > { %1014 = vmatpush.msrb.mxu3 %v932_v38  ;;  %950 = vmatpush.msrb.mxu2 %v915_v39 }
  0x93   : > { %1015 = vmatpush.msrb.mxu3 %v931_v46 }
  0x96   : > { %418 = vmatmul.f32.gmra.mxu0 %v336_v56  ;;  %483 = vmatmul.f32.gmra.mxu1 %v336_v56 }
  0x9e   : > { %421 = vmatmul.f32.gmra.mxu0 %v337_v59  ;;  %486 = vmatmul.f32.gmra.mxu1 %v337_v59 }
  0xa6   : > { %424 = vmatmul.f32.gmra.mxu0 %v338_v62  ;;  %489 = vmatmul.f32.gmra.mxu1 %v338_v62 }
  0xae   : > { %427 = vmatmul.f32.gmra.mxu0 %v339_v6  ;;  %492 = vmatmul.f32.gmra.mxu1 %v339_v6 }
  0xb6   : > { %430 = vmatmul.f32.gmra.mxu0 %v340_v17  ;;  %495 = vmatmul.f32.gmra.mxu1 %v340_v17 }
  0xbe   : > { %433 = vmatmul.f32.gmra.mxu0 %v341_v28  ;;  %498 = vmatmul.f32.gmra.mxu1 %v341_v28 }
  0xc6   : > { %436 = vmatmul.f32.gmra.mxu0 %v342_v37  ;;  %501 = vmatmul.f32.gmra.mxu1 %v342_v37 }
  0xce   : > { %439 = vmatmul.f32.gmra.mxu0 %v343_v45  ;;  %504 = vmatmul.f32.gmra.mxu1 %v343_v45 }
  0xd6   : > { %442 = vmatmul.f32.gmra.mxu0 %v344_v47  ;;  %507 = vmatmul.f32.gmra.mxu1 %v344_v47  ;;  %v914_v47 = vld [vmem:[%s2334_s5 + $0x30] sm:$0xff] }
  0xd7   : > { %951 = vmatpush.msrb.mxu2 %v914_v47 }
  0xde   : > { %445 = vmatmul.f32.gmra.mxu0 %v345_v50  ;;  %510 = vmatmul.f32.gmra.mxu1 %v345_v50 }
  0xe3   : > { %v401_v56 = vpop.f32.mrf.mxu0  ;;  %v466_v57 = vpop.f32.mrf.mxu1 }
  0xe4   : > { %v402_v58 = vadd.f32 %v401_v56, %v2010_v53  ;;  %v467_v59 = vadd.f32 %v466_v57, %v2012_v54  ;;  %v930_v56 = vld [vmem:[%s2334_s5 + $0xb0] sm:$0xff]  ;;  %v913_v57 = vld [vmem:[%s2334_s5 + $0x28] sm:$0xff] }
  0xe5   : > { %1016 = vmatpush.msrb.mxu3 %v930_v56  ;;  %952 = vmatpush.msrb.mxu2 %v913_v57 }
  0xe6   : > { %v514_v61 = vmax.f32 %v402_v58, 0.0  ;;  %v515_v62 = vmax.f32 %v467_v59, 0.0 }
  0xe8   : > { %632 = vmatmul.f32.vlgmr.msra.gmra.mxu2 %v514_v61  ;;  %762 = vmatmul.f32.vlgmr.msrb.gmra.mxu0 %v514_v61 }
  0xe9   : > { %697 = vmatmul.f32.vlgmr.msra.gmra.mxu3 %v515_v62  ;;  %827 = vmatmul.f32.vlgmr.msrb.gmra.mxu1 %v515_v62 }
  0xeb   : > { %v404_v0 = vpop.f32.mrf.mxu0  ;;  %v469_v1 = vpop.f32.mrf.mxu1 }
  0xec   : > { %v405_v2 = vadd.f32 %v404_v0, %v2010_v53  ;;  %v470_v3 = vadd.f32 %v469_v1, %v2012_v54  ;;  %v929_v0 = vld [vmem:[%s2334_s5 + $0xa8] sm:$0xff]  ;;  %v912_v1 = vld [vmem:[%s2334_s5 + $0x20] sm:$0xff] }
  0xed   : > { %1017 = vmatpush.msrb.mxu3 %v929_v0  ;;  %953 = vmatpush.msrb.mxu2 %v912_v1 }
  0xee   : > { %v516_v5 = vmax.f32 %v405_v2, 0.0  ;;  %v517_v6 = vmax.f32 %v470_v3, 0.0 }
  0xf0   : > { %635 = vmatmul.f32.gmra.mxu2 %v516_v5  ;;  %765 = vmatmul.f32.gmra.mxu0 %v516_v5 }
  0xf1   : > { %700 = vmatmul.f32.gmra.mxu3 %v517_v6  ;;  %830 = vmatmul.f32.gmra.mxu1 %v517_v6 }
  0xf3   : > { %v407_v8 = vpop.f32.mrf.mxu0  ;;  %v472_v9 = vpop.f32.mrf.mxu1 }
  0xf4   : > { %v408_v10 = vadd.f32 %v407_v8, %v2010_v53  ;;  %v473_v11 = vadd.f32 %v472_v9, %v2012_v54  ;;  %v928_v8 = vld [vmem:[%s2334_s5 + $0xa0] sm:$0xff]  ;;  %v911_v9 = vld [vmem:[%s2334_s5 + $0x18] sm:$0xff] }
  0xf5   : > { %1018 = vmatpush.msrb.mxu3 %v928_v8  ;;  %954 = vmatpush.msrb.mxu2 %v911_v9 }
  0xf6   : > { %v518_v13 = vmax.f32 %v408_v10, 0.0  ;;  %v519_v14 = vmax.f32 %v473_v11, 0.0 }
  0xf8   : > { %638 = vmatmul.f32.gmra.mxu2 %v518_v13  ;;  %768 = vmatmul.f32.gmra.mxu0 %v518_v13 }
  0xf9   : > { %703 = vmatmul.f32.gmra.mxu3 %v519_v14  ;;  %833 = vmatmul.f32.gmra.mxu1 %v519_v14 }
  0xfb   : > { %v410_v16 = vpop.f32.mrf.mxu0  ;;  %v475_v17 = vpop.f32.mrf.mxu1 }
  0xfc   : > { %v411_v18 = vadd.f32 %v410_v16, %v2010_v53  ;;  %v476_v19 = vadd.f32 %v475_v17, %v2012_v54  ;;  %v927_v16 = vld [vmem:[%s2334_s5 + $0x98] sm:$0xff]  ;;  %v910_v17 = vld [vmem:[%s2334_s5 + $0x10] sm:$0xff] }
  0xfd   : > { %1019 = vmatpush.msrb.mxu3 %v927_v16  ;;  %955 = vmatpush.msrb.mxu2 %v910_v17 }
  0xfe   : > { %v520_v21 = vmax.f32 %v411_v18, 0.0  ;;  %v521_v22 = vmax.f32 %v476_v19, 0.0 }
 0x100   : > { %641 = vmatmul.f32.gmra.mxu2 %v520_v21  ;;  %771 = vmatmul.f32.gmra.mxu0 %v520_v21 }
 0x101   : > { %706 = vmatmul.f32.gmra.mxu3 %v521_v22  ;;  %836 = vmatmul.f32.gmra.mxu1 %v521_v22 }
 0x103   : > { %v413_v24 = vpop.f32.mrf.mxu0  ;;  %v478_v25 = vpop.f32.mrf.mxu1 }
 0x104   : > { %v414_v26 = vadd.f32 %v413_v24, %v2010_v53  ;;  %v479_v27 = vadd.f32 %v478_v25, %v2012_v54  ;;  %v926_v24 = vld [vmem:[%s2334_s5 + $0x90] sm:$0xff]  ;;  %v909_v25 = vld [vmem:[%s2334_s5 + $0x8] sm:$0xff] }
 0x105   : > { %1020 = vmatpush.msrb.mxu3 %v926_v24  ;;  %956 = vmatpush.msrb.mxu2 %v909_v25 }
 0x106   : > { %v522_v28 = vmax.f32 %v414_v26, 0.0  ;;  %v523_v29 = vmax.f32 %v479_v27, 0.0  ;;  %v925_v26 = vld [vmem:[%s2334_s5 + $0x88] sm:$0xff] }
 0x107   : > { %1021 = vmatpush.msrb.mxu3 %v925_v26 }
 0x108   : > { %644 = vmatmul.f32.gmra.mxu2 %v522_v28  ;;  %774 = vmatmul.f32.gmra.mxu0 %v522_v28 }
 0x109   : > { %709 = vmatmul.f32.gmra.mxu3 %v523_v29  ;;  %839 = vmatmul.f32.gmra.mxu1 %v523_v29 }
 0x10b   : > { %v416_v32 = vpop.f32.mrf.mxu0  ;;  %v481_v33 = vpop.f32.mrf.mxu1 }
 0x10c   : > { %v417_v34 = vadd.f32 %v416_v32, %v2010_v53  ;;  %v482_v35 = vadd.f32 %v481_v33, %v2012_v54  ;;  %v908_v33 = vld [vmem:[%s2334_s5] sm:$0xff] }
 0x10d   : > { %957 = vmatpush.msrb.mxu2 %v908_v33 }
 0x10e   : > { %v524_v36 = vmax.f32 %v417_v34, 0.0  ;;  %v525_v37 = vmax.f32 %v482_v35, 0.0  ;;  %v924_v34 = vld [vmem:[%s2334_s5 + $0x80] sm:$0xff] }
 0x10f   : > { %1022 = vmatpush.msrb.mxu3 %v924_v34 }
 0x110   : > { %647 = vmatmul.f32.gmra.mxu2 %v524_v36  ;;  %777 = vmatmul.f32.gmra.mxu0 %v524_v36 }
 0x111   : > { %712 = vmatmul.f32.gmra.mxu3 %v525_v37  ;;  %842 = vmatmul.f32.gmra.mxu1 %v525_v37 }
 0x113   : > { %v419_v40 = vpop.f32.mrf.mxu0  ;;  %v484_v41 = vpop.f32.mrf.mxu1 }
 0x114   : > { %v420_v42 = vadd.f32 %v419_v40, %v2010_v53  ;;  %v485_v43 = vadd.f32 %v484_v41, %v2012_v54 }
 0x116   : > { %v526_v44 = vmax.f32 %v420_v42, 0.0  ;;  %v527_v45 = vmax.f32 %v485_v43, 0.0 }
 0x118   : > { %650 = vmatmul.f32.gmra.mxu2 %v526_v44  ;;  %780 = vmatmul.f32.gmra.mxu0 %v526_v44 }
 0x119   : > { %715 = vmatmul.f32.gmra.mxu3 %v527_v45  ;;  %845 = vmatmul.f32.gmra.mxu1 %v527_v45 }
 0x11b   : > { %v422_v48 = vpop.f32.mrf.mxu0  ;;  %v487_v49 = vpop.f32.mrf.mxu1 }
 0x11c   : > { %v423_v50 = vadd.f32 %v422_v48, %v2010_v53  ;;  %v488_v51 = vadd.f32 %v487_v49, %v2012_v54 }
 0x11e   : > { %v528_v52 = vmax.f32 %v423_v50, 0.0  ;;  %v529_v55 = vmax.f32 %v488_v51, 0.0 }
 0x120   : > { %653 = vmatmul.f32.gmra.mxu2 %v528_v52  ;;  %783 = vmatmul.f32.gmra.mxu0 %v528_v52 }
 0x121   : > { %718 = vmatmul.f32.gmra.mxu3 %v529_v55  ;;  %848 = vmatmul.f32.gmra.mxu1 %v529_v55  ;;  %v610_v55 = vld [vmem:[%s2333_s4] sm:$0x3] }
 0x122   : > { %v2133_v56 = vperm.slane %v610_v55, 1 }
 0x123   : > { %v425_v58 = vpop.f32.mrf.mxu0  ;;  %v490_v59 = vpop.f32.mrf.mxu1 }
 0x124   : > { %v426_v60 = vadd.f32 %v425_v58, %v2010_v53  ;;  %v491_v61 = vadd.f32 %v490_v59, %v2012_v54 }
 0x126   : > { %v530_v62 = vmax.f32 %v426_v60, 0.0  ;;  %v531_v63 = vmax.f32 %v491_v61, 0.0 }
 0x128   : > { %656 = vmatmul.f32.gmra.mxu2 %v530_v62  ;;  %786 = vmatmul.f32.gmra.mxu0 %v530_v62 }
 0x129   : > { %721 = vmatmul.f32.gmra.mxu3 %v531_v63  ;;  %851 = vmatmul.f32.gmra.mxu1 %v531_v63 }
 0x12b   : > { %v428_v2 = vpop.f32.mrf.mxu0  ;;  %v493_v3 = vpop.f32.mrf.mxu1 }
 0x12c   : > { %v429_v4 = vadd.f32 %v428_v2, %v2010_v53  ;;  %v494_v5 = vadd.f32 %v493_v3, %v2012_v54 }
 0x12e   : > { %v532_v6 = vmax.f32 %v429_v4, 0.0  ;;  %v533_v7 = vmax.f32 %v494_v5, 0.0 }
 0x130   : > { %659 = vmatmul.f32.gmra.mxu2 %v532_v6  ;;  %789 = vmatmul.f32.gmra.mxu0 %v532_v6 }
 0x131   : > { %724 = vmatmul.f32.gmra.mxu3 %v533_v7  ;;  %854 = vmatmul.f32.gmra.mxu1 %v533_v7 }
 0x133   : > { %v431_v10 = vpop.f32.mrf.mxu0  ;;  %v496_v11 = vpop.f32.mrf.mxu1 }
 0x134   : > { %v432_v12 = vadd.f32 %v431_v10, %v2010_v53  ;;  %v497_v13 = vadd.f32 %v496_v11, %v2012_v54 }
 0x136   : > { %v534_v14 = vmax.f32 %v432_v12, 0.0  ;;  %v535_v15 = vmax.f32 %v497_v13, 0.0 }
 0x138   : > { %662 = vmatmul.f32.gmra.mxu2 %v534_v14  ;;  %792 = vmatmul.f32.gmra.mxu0 %v534_v14 }
 0x139   : > { %727 = vmatmul.f32.gmra.mxu3 %v535_v15  ;;  %857 = vmatmul.f32.gmra.mxu1 %v535_v15 }
 0x13b   : > { %v434_v18 = vpop.f32.mrf.mxu0  ;;  %v499_v19 = vpop.f32.mrf.mxu1 }
 0x13c   : > { %v435_v20 = vadd.f32 %v434_v18, %v2010_v53  ;;  %v500_v21 = vadd.f32 %v499_v19, %v2012_v54 }
 0x13e   : > { %v536_v22 = vmax.f32 %v435_v20, 0.0  ;;  %v537_v23 = vmax.f32 %v500_v21, 0.0 }
 0x140   : > { %665 = vmatmul.f32.gmra.mxu2 %v536_v22  ;;  %795 = vmatmul.f32.gmra.mxu0 %v536_v22 }
 0x141   : > { %730 = vmatmul.f32.gmra.mxu3 %v537_v23  ;;  %860 = vmatmul.f32.gmra.mxu1 %v537_v23 }
 0x143   : > { %v437_v27 = vpop.f32.mrf.mxu0  ;;  %v502_v28 = vpop.f32.mrf.mxu1 }
 0x144   : > { %v438_v29 = vadd.f32 %v437_v27, %v2010_v53  ;;  %v503_v30 = vadd.f32 %v502_v28, %v2012_v54 }
 0x146   : > { %v538_v31 = vmax.f32 %v438_v29, 0.0  ;;  %v539_v32 = vmax.f32 %v503_v30, 0.0 }
 0x148   : > { %668 = vmatmul.f32.gmra.mxu2 %v538_v31  ;;  %798 = vmatmul.f32.gmra.mxu0 %v538_v31 }
 0x149   : > { %733 = vmatmul.f32.gmra.mxu3 %v539_v32  ;;  %863 = vmatmul.f32.gmra.mxu1 %v539_v32 }
 0x14b   : > { %v440_v35 = vpop.f32.mrf.mxu0  ;;  %v505_v36 = vpop.f32.mrf.mxu1 }
 0x14c   : > { %v441_v37 = vadd.f32 %v440_v35, %v2010_v53  ;;  %v506_v38 = vadd.f32 %v505_v36, %v2012_v54 }
 0x14e   : > { %v540_v39 = vmax.f32 %v441_v37, 0.0  ;;  %v541_v40 = vmax.f32 %v506_v38, 0.0 }
 0x150   : > { %671 = vmatmul.f32.gmra.mxu2 %v540_v39  ;;  %801 = vmatmul.f32.gmra.mxu0 %v540_v39 }
 0x151   : > { %736 = vmatmul.f32.gmra.mxu3 %v541_v40  ;;  %866 = vmatmul.f32.gmra.mxu1 %v541_v40 }
 0x153   : > { %v443_v41 = vpop.f32.mrf.mxu0  ;;  %v508_v42 = vpop.f32.mrf.mxu1 }
 0x154   : > { %v444_v43 = vadd.f32 %v443_v41, %v2010_v53  ;;  %v509_v44 = vadd.f32 %v508_v42, %v2012_v54 }
 0x156   : > { %v542_v45 = vmax.f32 %v444_v43, 0.0  ;;  %v543_v46 = vmax.f32 %v509_v44, 0.0 }
 0x158   : > { %674 = vmatmul.f32.gmra.mxu2 %v542_v45  ;;  %804 = vmatmul.f32.gmra.mxu0 %v542_v45 }
 0x159   : > { %739 = vmatmul.f32.gmra.mxu3 %v543_v46  ;;  %869 = vmatmul.f32.gmra.mxu1 %v543_v46 }
 0x15b   : > { %v446_v47 = vpop.f32.mrf.mxu0  ;;  %v511_v48 = vpop.f32.mrf.mxu1 }
 0x15c   : > { %v447_v49 = vadd.f32 %v446_v47, %v2010_v53  ;;  %v512_v50 = vadd.f32 %v511_v48, %v2012_v54  ;;  %v2136_v53 = vperm.slane %v610_v55, 0 }
 0x15e   : > { %v544_v51 = vmax.f32 %v447_v49, 0.0  ;;  %v545_v52 = vmax.f32 %v512_v50, 0.0 }
 0x160   : > { %677 = vmatmul.f32.gmra.mxu2 %v544_v51  ;;  %807 = vmatmul.f32.gmra.mxu0 %v544_v51 }
 0x161   : > { %742 = vmatmul.f32.gmra.mxu3 %v545_v52  ;;  %872 = vmatmul.f32.gmra.mxu1 %v545_v52 }
 0x165   : > { %v763_v57 = vpop.f32.mrf.mxu0 }
 0x166   : > { %v764_v58 = vadd.f32 %v763_v57, %v2133_v56  ;;  %v828_v59 = vpop.f32.mrf.mxu1 }
 0x168   : > { %v829_v60 = vadd.f32 %v828_v59, %v764_v58 }
 0x16a   : > { %v877_v54 = vmax.f32 %v829_v60, 0.0 }
 0x16b   : > { %v633_v61 = vpop.f32.mrf.mxu2 }
 0x16c   : > { %v634_v62 = vadd.f32 %v633_v61, %v2136_v53  ;;  %1023 = vmatmul.f32.vlgmr.msrb.gmra.mxu3 %v877_v54  ;;  %v698_v63 = vpop.f32.mrf.mxu3 }
 0x16d   : > { %v766_v0 = vpop.f32.mrf.mxu0 }
 0x16e   : > { %v699_v1 = vadd.f32 %v698_v63, %v634_v62  ;;  %v767_v2 = vadd.f32 %v766_v0, %v2133_v56  ;;  %v831_v3 = vpop.f32.mrf.mxu1 }
 0x170   : > { %v876_v4 = vmax.f32 %v699_v1, 0.0  ;;  %v832_v5 = vadd.f32 %v831_v3, %v767_v2 }
 0x172   : > { %v879_v6 = vmax.f32 %v832_v5, 0.0  ;;  %958 = vmatmul.f32.vlgmr.msrb.gmra.mxu2 %v876_v4 }
 0x173   : > { %v636_v7 = vpop.f32.mrf.mxu2 }
 0x174   : > { %v637_v8 = vadd.f32 %v636_v7, %v2136_v53  ;;  %1026 = vmatmul.f32.gmra.mxu3 %v879_v6  ;;  %v701_v9 = vpop.f32.mrf.mxu3 }
 0x175   : > { %v769_v10 = vpop.f32.mrf.mxu0 }
 0x176   : > { %v702_v11 = vadd.f32 %v701_v9, %v637_v8  ;;  %v770_v12 = vadd.f32 %v769_v10, %v2133_v56  ;;  %v834_v13 = vpop.f32.mrf.mxu1 }
 0x178   : > { %v835_v14 = vadd.f32 %v834_v13, %v770_v12  ;;  %v878_v15 = vmax.f32 %v702_v11, 0.0 }
 0x17a   : > { %v881_v16 = vmax.f32 %v835_v14, 0.0  ;;  %961 = vmatmul.f32.gmra.mxu2 %v878_v15 }
 0x17b   : > { %v639_v17 = vpop.f32.mrf.mxu2 }
 0x17c   : > { %v640_v18 = vadd.f32 %v639_v17, %v2136_v53  ;;  %1029 = vmatmul.f32.gmra.mxu3 %v881_v16  ;;  %v704_v19 = vpop.f32.mrf.mxu3 }
 0x17d   : > { %v772_v20 = vpop.f32.mrf.mxu0 }
 0x17e   : > { %v705_v21 = vadd.f32 %v704_v19, %v640_v18  ;;  %v773_v22 = vadd.f32 %v772_v20, %v2133_v56  ;;  %v837_v23 = vpop.f32.mrf.mxu1 }
 0x180   : > { %v838_v24 = vadd.f32 %v837_v23, %v773_v22  ;;  %v880_v25 = vmax.f32 %v705_v21, 0.0 }
 0x182   : > { %v883_v26 = vmax.f32 %v838_v24, 0.0  ;;  %964 = vmatmul.f32.gmra.mxu2 %v880_v25 }
 0x183   : > { %v642_v27 = vpop.f32.mrf.mxu2 }
 0x184   : > { %v643_v28 = vadd.f32 %v642_v27, %v2136_v53  ;;  %1032 = vmatmul.f32.gmra.mxu3 %v883_v26  ;;  %v707_v29 = vpop.f32.mrf.mxu3 }
 0x185   : > { %v775_v30 = vpop.f32.mrf.mxu0 }
 0x186   : > { %v708_v31 = vadd.f32 %v707_v29, %v643_v28  ;;  %v776_v32 = vadd.f32 %v775_v30, %v2133_v56  ;;  %v840_v33 = vpop.f32.mrf.mxu1 }
 0x188   : > { %v841_v34 = vadd.f32 %v840_v33, %v776_v32  ;;  %v882_v35 = vmax.f32 %v708_v31, 0.0 }
 0x18a   : > { %v885_v36 = vmax.f32 %v841_v34, 0.0  ;;  %967 = vmatmul.f32.gmra.mxu2 %v882_v35 }
 0x18b   : > { %v645_v37 = vpop.f32.mrf.mxu2 }
 0x18c   : > { %v646_v38 = vadd.f32 %v645_v37, %v2136_v53  ;;  %1035 = vmatmul.f32.gmra.mxu3 %v885_v36  ;;  %v710_v39 = vpop.f32.mrf.mxu3 }
 0x18d   : > { %v778_v40 = vpop.f32.mrf.mxu0 }
 0x18e   : > { %v711_v41 = vadd.f32 %v710_v39, %v646_v38  ;;  %v779_v42 = vadd.f32 %v778_v40, %v2133_v56  ;;  %v843_v43 = vpop.f32.mrf.mxu1 }
 0x190   : > { %v844_v44 = vadd.f32 %v843_v43, %v779_v42  ;;  %v884_v45 = vmax.f32 %v711_v41, 0.0 }
 0x192   : > { %v887_v46 = vmax.f32 %v844_v44, 0.0  ;;  %970 = vmatmul.f32.gmra.mxu2 %v884_v45 }
 0x193   : > { %v648_v47 = vpop.f32.mrf.mxu2 }
 0x194   : > { %v649_v48 = vadd.f32 %v648_v47, %v2136_v53  ;;  %1038 = vmatmul.f32.gmra.mxu3 %v887_v46  ;;  %v713_v49 = vpop.f32.mrf.mxu3 }
 0x195   : > { %v781_v50 = vpop.f32.mrf.mxu0 }
 0x196   : > { %v714_v51 = vadd.f32 %v713_v49, %v649_v48  ;;  %v782_v52 = vadd.f32 %v781_v50, %v2133_v56  ;;  %v846_v55 = vpop.f32.mrf.mxu1 }
 0x198   : > { %v847_v57 = vadd.f32 %v846_v55, %v782_v52  ;;  %v886_v58 = vmax.f32 %v714_v51, 0.0 }
 0x19a   : > { %v889_v59 = vmax.f32 %v847_v57, 0.0  ;;  %973 = vmatmul.f32.gmra.mxu2 %v886_v58 }
 0x19b   : > { %v651_v60 = vpop.f32.mrf.mxu2 }
 0x19c   : > { %v652_v54 = vadd.f32 %v651_v60, %v2136_v53  ;;  %1041 = vmatmul.f32.gmra.mxu3 %v889_v59  ;;  %v716_v61 = vpop.f32.mrf.mxu3 }
 0x19d   : > { %v784_v62 = vpop.f32.mrf.mxu0 }
 0x19e   : > { %v717_v63 = vadd.f32 %v716_v61, %v652_v54  ;;  %v785_v0 = vadd.f32 %v784_v62, %v2133_v56  ;;  %v849_v1 = vpop.f32.mrf.mxu1 }
 0x1a0   : > { %v850_v2 = vadd.f32 %v849_v1, %v785_v0  ;;  %v888_v3 = vmax.f32 %v717_v63, 0.0 }
 0x1a2   : > { %v891_v4 = vmax.f32 %v850_v2, 0.0  ;;  %976 = vmatmul.f32.gmra.mxu2 %v888_v3 }
 0x1a3   : > { %v654_v5 = vpop.f32.mrf.mxu2 }
 0x1a4   : > { %v655_v6 = vadd.f32 %v654_v5, %v2136_v53  ;;  %1044 = vmatmul.f32.gmra.mxu3 %v891_v4  ;;  %v719_v7 = vpop.f32.mrf.mxu3 }
 0x1a5   : > { %v787_v8 = vpop.f32.mrf.mxu0 }
 0x1a6   : > { %v720_v9 = vadd.f32 %v719_v7, %v655_v6  ;;  %v788_v10 = vadd.f32 %v787_v8, %v2133_v56  ;;  %v852_v11 = vpop.f32.mrf.mxu1 }
 0x1a8   : > { %v853_v12 = vadd.f32 %v852_v11, %v788_v10  ;;  %v890_v13 = vmax.f32 %v720_v9, 0.0 }
 0x1aa   : > { %v893_v14 = vmax.f32 %v853_v12, 0.0  ;;  %979 = vmatmul.f32.gmra.mxu2 %v890_v13 }
 0x1ab   : > { %v657_v15 = vpop.f32.mrf.mxu2 }
 0x1ac   : > { %v658_v16 = vadd.f32 %v657_v15, %v2136_v53  ;;  %1047 = vmatmul.f32.gmra.mxu3 %v893_v14  ;;  %v722_v17 = vpop.f32.mrf.mxu3 }
 0x1ad   : > { %v790_v18 = vpop.f32.mrf.mxu0 }
 0x1ae   : > { %v723_v19 = vadd.f32 %v722_v17, %v658_v16  ;;  %v791_v20 = vadd.f32 %v790_v18, %v2133_v56  ;;  %v855_v21 = vpop.f32.mrf.mxu1 }
 0x1b0   : > { %v892_v22 = vmax.f32 %v723_v19, 0.0  ;;  %v856_v23 = vadd.f32 %v855_v21, %v791_v20 }
 0x1b2   : > { %v895_v24 = vmax.f32 %v856_v23, 0.0  ;;  %982 = vmatmul.f32.gmra.mxu2 %v892_v22 }
 0x1b3   : > { %v660_v25 = vpop.f32.mrf.mxu2 }
 0x1b4   : > { %v661_v26 = vadd.f32 %v660_v25, %v2136_v53  ;;  %1050 = vmatmul.f32.gmra.mxu3 %v895_v24  ;;  %v725_v27 = vpop.f32.mrf.mxu3 }
 0x1b5   : > { %v793_v28 = vpop.f32.mrf.mxu0 }
 0x1b6   : > { %v726_v29 = vadd.f32 %v725_v27, %v661_v26  ;;  %v794_v30 = vadd.f32 %v793_v28, %v2133_v56  ;;  %v858_v31 = vpop.f32.mrf.mxu1 }
 0x1b8   : > { %v894_v32 = vmax.f32 %v726_v29, 0.0  ;;  %v859_v33 = vadd.f32 %v858_v31, %v794_v30  ;;  %v2169_v29 = vstv %s940_s14 }
 0x1ba   : > { %v897_v34 = vmax.f32 %v859_v33, 0.0  ;;  %985 = vmatmul.f32.gmra.mxu2 %v894_v32 }
 0x1bb   : > { %v663_v35 = vpop.f32.mrf.mxu2 }
 0x1bc   : > { %v664_v36 = vadd.f32 %v663_v35, %v2136_v53  ;;  %1053 = vmatmul.f32.gmra.mxu3 %v897_v34  ;;  %v728_v37 = vpop.f32.mrf.mxu3 }
 0x1bd   : > { %v796_v38 = vpop.f32.mrf.mxu0 }
 0x1be   : > { %v729_v39 = vadd.f32 %v728_v37, %v664_v36  ;;  %v797_v40 = vadd.f32 %v796_v38, %v2133_v56  ;;  %v861_v41 = vpop.f32.mrf.mxu1 }
 0x1c0   : > { %v896_v42 = vmax.f32 %v729_v39, 0.0  ;;  %v862_v43 = vadd.f32 %v861_v41, %v797_v40 }
 0x1c2   : > { %v899_v44 = vmax.f32 %v862_v43, 0.0  ;;  %988 = vmatmul.f32.gmra.mxu2 %v896_v42 }
 0x1c3   : > { %v666_v45 = vpop.f32.mrf.mxu2 }
 0x1c4   : > { %v667_v46 = vadd.f32 %v666_v45, %v2136_v53  ;;  %1056 = vmatmul.f32.gmra.mxu3 %v899_v44  ;;  %v731_v47 = vpop.f32.mrf.mxu3 }
 0x1c5   : > { %v799_v48 = vpop.f32.mrf.mxu0 }
 0x1c6   : > { %v732_v49 = vadd.f32 %v731_v47, %v667_v46  ;;  %v800_v50 = vadd.f32 %v799_v48, %v2133_v56  ;;  %v864_v51 = vpop.f32.mrf.mxu1 }
 0x1c8   : > { %v898_v52 = vmax.f32 %v732_v49, 0.0  ;;  %v865_v55 = vadd.f32 %v864_v51, %v800_v50 }
 0x1ca   : > { %v901_v57 = vmax.f32 %v865_v55, 0.0  ;;  %991 = vmatmul.f32.gmra.mxu2 %v898_v52 }
 0x1cb   : > { %v669_v58 = vpop.f32.mrf.mxu2 }
 0x1cc   : > { %v670_v59 = vadd.f32 %v669_v58, %v2136_v53  ;;  %1059 = vmatmul.f32.gmra.mxu3 %v901_v57  ;;  %v734_v60 = vpop.f32.mrf.mxu3 }
 0x1cd   : > { %v802_v54 = vpop.f32.mrf.mxu0 }
 0x1ce   : > { %v735_v61 = vadd.f32 %v734_v60, %v670_v59  ;;  %v803_v62 = vadd.f32 %v802_v54, %v2133_v56  ;;  %v867_v63 = vpop.f32.mrf.mxu1 }
 0x1d0   : > { %v900_v0 = vmax.f32 %v735_v61, 0.0  ;;  %v868_v1 = vadd.f32 %v867_v63, %v803_v62 }
 0x1d2   : > { %v903_v2 = vmax.f32 %v868_v1, 0.0  ;;  %994 = vmatmul.f32.gmra.mxu2 %v900_v0 }
 0x1d3   : > { %v672_v3 = vpop.f32.mrf.mxu2 }
 0x1d4   : > { %v673_v4 = vadd.f32 %v672_v3, %v2136_v53  ;;  %1062 = vmatmul.f32.gmra.mxu3 %v903_v2  ;;  %v737_v5 = vpop.f32.mrf.mxu3 }
 0x1d5   : > { %v805_v6 = vpop.f32.mrf.mxu0 }
 0x1d6   : > { %v738_v7 = vadd.f32 %v737_v5, %v673_v4  ;;  %v806_v8 = vadd.f32 %v805_v6, %v2133_v56  ;;  %v870_v9 = vpop.f32.mrf.mxu1 }
 0x1d8   : > { %v902_v10 = vmax.f32 %v738_v7, 0.0  ;;  %v871_v11 = vadd.f32 %v870_v9, %v806_v8 }
 0x1da   : > { %v905_v12 = vmax.f32 %v871_v11, 0.0  ;;  %997 = vmatmul.f32.gmra.mxu2 %v902_v10 }
 0x1db   : > { %v675_v13 = vpop.f32.mrf.mxu2 }
 0x1dc   : > { %v676_v14 = vadd.f32 %v675_v13, %v2136_v53  ;;  %1065 = vmatmul.f32.gmra.mxu3 %v905_v12  ;;  %v740_v15 = vpop.f32.mrf.mxu3 }
 0x1dd   : > { %v808_v16 = vpop.f32.mrf.mxu0 }
 0x1de   : > { %v741_v17 = vadd.f32 %v740_v15, %v676_v14  ;;  %v809_v18 = vadd.f32 %v808_v16, %v2133_v56  ;;  %v873_v19 = vpop.f32.mrf.mxu1 }
 0x1e0   : > { %v904_v20 = vmax.f32 %v741_v17, 0.0  ;;  %v874_v21 = vadd.f32 %v873_v19, %v809_v18 }
 0x1e2   : > { %v907_v22 = vmax.f32 %v874_v21, 0.0  ;;  %1000 = vmatmul.f32.gmra.mxu2 %v904_v20 }
 0x1e3   : > { %v678_v23 = vpop.f32.mrf.mxu2 }
 0x1e4   : > { %v679_v24 = vadd.f32 %v678_v23, %v2136_v53  ;;  %1068 = vmatmul.f32.gmra.mxu3 %v907_v22  ;;  %v743_v25 = vpop.f32.mrf.mxu3 }
 0x1e6   : > { %v744_v26 = vadd.f32 %v743_v25, %v679_v24 }
 0x1e8   : > { %v906_v27 = vmax.f32 %v744_v26, 0.0 }
 0x1ea   : > { %1003 = vmatmul.f32.gmra.mxu2 %v906_v27 }
 0x1ef   : > { %v1024_v28 = vpop.f32.mrf.mxu3 }
 0x1f5   : > { %v959_v30 = vpop.f32.mrf.mxu2 }
 0x1f6   : > { %v960_v56 = vadd.f32 %v959_v30, %v2169_v29 }
 0x1f7   : > { %v1027_v31 = vpop.f32.mrf.mxu3 }
 0x1f8   : > { %v1025_v32 = vadd.f32 %v1024_v28, %v960_v56 }
 0x1fa   : > { %1073 = vst.msk [vmem:[%s2173_s25] sm:$0xff] %vm1072_vm0, %v1025_v32 }
 0x1fd   : > { %v962_v53 = vpop.f32.mrf.mxu2 }
 0x1fe   : > { %v963_v33 = vadd.f32 %v962_v53, %v2169_v29 }
 0x1ff   : > { %v1030_v34 = vpop.f32.mrf.mxu3 }
 0x200   : > { %v1028_v35 = vadd.f32 %v1027_v31, %v963_v33 }
 0x202   : > { %1074 = vst.msk [vmem:[%s2173_s25 + $0x8] sm:$0xff] %vm1072_vm0, %v1028_v35 }
 0x205   : > { %v965_v36 = vpop.f32.mrf.mxu2 }
 0x206   : > { %v966_v37 = vadd.f32 %v965_v36, %v2169_v29 }
 0x207   : > { %v1033_v38 = vpop.f32.mrf.mxu3 }
 0x208   : > { %v1031_v39 = vadd.f32 %v1030_v34, %v966_v37 }
 0x20a   : > { %1075 = vst.msk [vmem:[%s2173_s25 + $0x10] sm:$0xff] %vm1072_vm0, %v1031_v39 }
 0x20d   : > { %v968_v40 = vpop.f32.mrf.mxu2 }
 0x20e   : > { %v969_v41 = vadd.f32 %v968_v40, %v2169_v29 }
 0x20f   : > { %v1036_v42 = vpop.f32.mrf.mxu3 }
 0x210   : > { %v1034_v43 = vadd.f32 %v1033_v38, %v969_v41 }
 0x212   : > { %1076 = vst.msk [vmem:[%s2173_s25 + $0x18] sm:$0xff] %vm1072_vm0, %v1034_v43 }
 0x215   : > { %v971_v44 = vpop.f32.mrf.mxu2 }
 0x216   : > { %v972_v45 = vadd.f32 %v971_v44, %v2169_v29 }
 0x217   : > { %v1039_v46 = vpop.f32.mrf.mxu3 }
 0x218   : > { %v1037_v47 = vadd.f32 %v1036_v42, %v972_v45 }
 0x21a   : > { %1077 = vst.msk [vmem:[%s2173_s25 + $0x20] sm:$0xff] %vm1072_vm0, %v1037_v47 }
 0x21d   : > { %v974_v48 = vpop.f32.mrf.mxu2 }
 0x21e   : > { %v975_v49 = vadd.f32 %v974_v48, %v2169_v29 }
 0x21f   : > { %v1042_v50 = vpop.f32.mrf.mxu3 }
 0x220   : > { %v1040_v51 = vadd.f32 %v1039_v46, %v975_v49 }
 0x222   : > { %1078 = vst.msk [vmem:[%s2173_s25 + $0x28] sm:$0xff] %vm1072_vm0, %v1040_v51 }
 0x225   : > { %v977_v52 = vpop.f32.mrf.mxu2 }
 0x226   : > { %v978_v55 = vadd.f32 %v977_v52, %v2169_v29 }
 0x227   : > { %v1045_v57 = vpop.f32.mrf.mxu3 }
 0x228   : > { %v1043_v58 = vadd.f32 %v1042_v50, %v978_v55 }
 0x22a   : > { %1079 = vst.msk [vmem:[%s2173_s25 + $0x30] sm:$0xff] %vm1072_vm0, %v1043_v58 }
 0x22d   : > { %v980_v59 = vpop.f32.mrf.mxu2 }
 0x22e   : > { %v981_v60 = vadd.f32 %v980_v59, %v2169_v29 }
 0x22f   : > { %v1048_v54 = vpop.f32.mrf.mxu3 }
 0x230   : > { %v1046_v61 = vadd.f32 %v1045_v57, %v981_v60 }
 0x232   : > { %1080 = vst.msk [vmem:[%s2173_s25 + $0x38] sm:$0xff] %vm1072_vm0, %v1046_v61 }
 0x235   : > { %v983_v62 = vpop.f32.mrf.mxu2 }
 0x236   : > { %v984_v63 = vadd.f32 %v983_v62, %v2169_v29 }
 0x237   : > { %v1051_v0 = vpop.f32.mrf.mxu3 }
 0x238   : > { %v1049_v1 = vadd.f32 %v1048_v54, %v984_v63 }
 0x23a   : > { %1081 = vst.msk [vmem:[%s2173_s25 + $0x40] sm:$0xff] %vm1072_vm0, %v1049_v1 }
 0x23d   : > { %v986_v2 = vpop.f32.mrf.mxu2 }
 0x23e   : > { %v987_v3 = vadd.f32 %v986_v2, %v2169_v29 }
 0x23f   : > { %v1054_v4 = vpop.f32.mrf.mxu3 }
 0x240   : > { %v1052_v5 = vadd.f32 %v1051_v0, %v987_v3 }
 0x242   : > { %1082 = vst.msk [vmem:[%s2173_s25 + $0x48] sm:$0xff] %vm1072_vm0, %v1052_v5 }
 0x245   : > { %v989_v6 = vpop.f32.mrf.mxu2 }
 0x246   : > { %v990_v7 = vadd.f32 %v989_v6, %v2169_v29 }
 0x247   : > { %v1057_v8 = vpop.f32.mrf.mxu3 }
 0x248   : > { %v1055_v9 = vadd.f32 %v1054_v4, %v990_v7 }
 0x24a   : > { %1083 = vst.msk [vmem:[%s2173_s25 + $0x50] sm:$0xff] %vm1072_vm0, %v1055_v9 }
 0x24d   : > { %v992_v10 = vpop.f32.mrf.mxu2 }
 0x24e   : > { %v993_v11 = vadd.f32 %v992_v10, %v2169_v29 }
 0x24f   : > { %v1060_v13 = vpop.f32.mrf.mxu3 }
 0x250   : > { %v1058_v12 = vadd.f32 %v1057_v8, %v993_v11 }
 0x252   : > { %1084 = vst.msk [vmem:[%s2173_s25 + $0x58] sm:$0xff] %vm1072_vm0, %v1058_v12 }
 0x255   : > { %v995_v14 = vpop.f32.mrf.mxu2 }
 0x256   : > { %v996_v15 = vadd.f32 %v995_v14, %v2169_v29 }
 0x257   : > { %v1063_v17 = vpop.f32.mrf.mxu3 }
 0x258   : > { %v1061_v16 = vadd.f32 %v1060_v13, %v996_v15 }
 0x25a   : > { %1085 = vst.msk [vmem:[%s2173_s25 + $0x60] sm:$0xff] %vm1072_vm0, %v1061_v16 }
 0x25d   : > { %v998_v18 = vpop.f32.mrf.mxu2 }
 0x25e   : > { %v999_v19 = vadd.f32 %v998_v18, %v2169_v29 }
 0x25f   : > { %v1066_v21 = vpop.f32.mrf.mxu3 }
 0x260   : > { %v1064_v20 = vadd.f32 %v1063_v17, %v999_v19 }
 0x262   : > { %1086 = vst.msk [vmem:[%s2173_s25 + $0x68] sm:$0xff] %vm1072_vm0, %v1064_v20 }
 0x265   : > { %v1001_v22 = vpop.f32.mrf.mxu2 }
 0x266   : > { %v1002_v23 = vadd.f32 %v1001_v22, %v2169_v29 }
 0x267   : > { %v1069_v27 = vpop.f32.mrf.mxu3 }
 0x268   : > { %v1067_v24 = vadd.f32 %v1066_v21, %v1002_v23 }
 0x26a   : > { %1087 = vst.msk [vmem:[%s2173_s25 + $0x70] sm:$0xff] %vm1072_vm0, %v1067_v24 }
 0x26d   : > { %v1004_v25 = vpop.f32.mrf.mxu2 }
 0x26e   : > { %v1005_v26 = vadd.f32 %v1004_v25, %v2169_v29  ;;  %1095 = sbr.rel (!%p1804_p10) target bundleno = 675 (0x2a3), region = 60 }
 0x270   : > { %v1070_v28 = vadd.f32 %v1069_v27, %v1005_v26 }
 0x272   : > { %1088 = vst.msk [vmem:[%s2173_s25 + $0x78] sm:$0xff] %vm1072_vm0, %v1070_v28 }
 0x273   : > { %s2357_s11 = smov (!%p1098_p8, %s1097_s11), 16 }
 0x274   : > { %s1403_s23 = sshll.u32 %s2357_s11, 3 }
 0x275   : > { %p1406_p11 = scmp.eq.s32.totalorder %s1403_s23, 0 }
 0x276   : > { %s2235_s13 = sshrl.u32 (!%p1406_p11), %s2357_s11, 4 }
 0x277   : > { %1106 = sbr.rel (%p1406_p11) target bundleno = 675 (0x2a3), region = 64  ;;  %p1407_p10 = scmp.le.s32.totalorder (!%p1406_p11), %s2235_s13, 0 }
 0x27c   : > { %1330 = sbr.rel (%p1407_p10) target bundleno = 658 (0x292), region = 146  ;;  %s2345_s6 = smov (!%p1407_p10), %s2229_s12 }
 0x27d   : > { %s2346_s19 = smov (!%p1407_p10), %s2173_s25  ;;  %s2244_s20 = smov (!%p1407_p10), 0  }
 0x27e   : > { %s2246_s29 = smov (!%p1407_p10), 0  }
 0x281 LB: >> { %v1199_v29 = vld [vmem:[%s1681_s19] sm:$0xff]  ;;  %v1201_v30 = vld [vmem:[%s1681_s19 + $0x8] sm:$0xff]  ;;  %v1203_v56 = vld [vmem:[%s1681_s19 + $0x10] sm:$0xff]  ;;  %s1231_s9 = sadd.s32 1, %s1685_s20  ;;  %s1193_s29 = sadd.s32 1, %s1689_s29   ;;  %s1689_s29 = sphi %s2246_s29, %s1193_s29   ;;  %s1685_s20 = sphi %s2244_s20, %s2349_s20   ;;  %s1681_s19 = sphi %s2346_s19, %s2348_s19   ;;  %s1677_s6 = sphi %s2345_s6, %s2347_s6  }
 0x282   : >> { %1200 = vst [vmem:[%s1677_s6] sm:$0xff] %v1199_v29  ;;  %v1205_v31 = vld [vmem:[%s1681_s19 + $0x18] sm:$0xff]  ;;  %p1232_p6 = scmp.ge.s32.totalorder %s1231_s9, %s2235_s13  ;;  %v1207_v32 = vld [vmem:[%s1681_s19 + $0x20] sm:$0xff]  ;;  %v1209_v53 = vld [vmem:[%s1681_s19 + $0x28] sm:$0xff]  ;;  %p1192_p7 = scmp.ge.s32.totalorder %s1193_s29, %s2235_s13 }
 0x283   : >> { %1202 = vst [vmem:[%s1677_s6 + $0x8] sm:$0xff] %v1201_v30  ;;  %v1211_v33 = vld [vmem:[%s1681_s19 + $0x30] sm:$0xff]  ;;  %v1213_v34 = vld [vmem:[%s1681_s19 + $0x38] sm:$0xff]  ;;  %v1215_v35 = vld [vmem:[%s1681_s19 + $0x40] sm:$0xff] }
 0x284   : >> { %1204 = vst [vmem:[%s1677_s6 + $0x10] sm:$0xff] %v1203_v56  ;;  %s2359_s9 = smov (%p1232_p6, %s1231_s9), 0  ;;  %v1217_v36 = vld [vmem:[%s1681_s19 + $0x48] sm:$0xff]  ;;  %v1219_v37 = vld [vmem:[%s1681_s19 + $0x50] sm:$0xff]  ;;  %v1221_v38 = vld [vmem:[%s1681_s19 + $0x58] sm:$0xff] }
 0x285   : >> { %1206 = vst [vmem:[%s1677_s6 + $0x18] sm:$0xff] %v1205_v31  ;;  %s1408_s18 = sshll.u32 %s2359_s9, 7  ;;  %v1223_v39 = vld [vmem:[%s1681_s19 + $0x60] sm:$0xff]  ;;  %v1225_v40 = vld [vmem:[%s1681_s19 + $0x68] sm:$0xff]  ;;  %v1227_v41 = vld [vmem:[%s1681_s19 + $0x70] sm:$0xff]  ;;  %s2349_s20 = smov %s2359_s9 }
 0x286   : >> { %1208 = vst [vmem:[%s1677_s6 + $0x20] sm:$0xff] %v1207_v32  ;;  %s1236_s24 = scalar_lea.vmem %s2173_s25, %s1408_s18 [#allocation7]   ;;  %s1237_s8 = scalar_lea.vmem %s2229_s12, %s1408_s18   ;;  %v1229_v42 = vld [vmem:[%s1681_s19 + $0x78] sm:$0xff] }
 0x287   : >> { %1210 = vst [vmem:[%s1677_s6 + $0x28] sm:$0xff] %v1209_v53  ;;  %s2348_s19 = smov %s1236_s24 }
 0x288   : >> { %1212 = vst [vmem:[%s1677_s6 + $0x30] sm:$0xff] %v1211_v33 }
 0x289   : >> { %1214 = vst [vmem:[%s1677_s6 + $0x38] sm:$0xff] %v1213_v34 }
 0x28a   : >> { %1216 = vst [vmem:[%s1677_s6 + $0x40] sm:$0xff] %v1215_v35 }
 0x28b   : >> { %1218 = vst [vmem:[%s1677_s6 + $0x48] sm:$0xff] %v1217_v36 }
 0x28c   : >> { %1220 = vst [vmem:[%s1677_s6 + $0x50] sm:$0xff] %v1219_v37 }
 0x28d   : >> { %1222 = vst [vmem:[%s1677_s6 + $0x58] sm:$0xff] %v1221_v38  ;;  %1195 = sbr.rel (!%p1192_p7) target bundleno = 641 (0x281), region = 152 }
 0x28e   : >> { %1224 = vst [vmem:[%s1677_s6 + $0x60] sm:$0xff] %v1223_v39 }
 0x28f   : >> { %1226 = vst [vmem:[%s1677_s6 + $0x68] sm:$0xff] %v1225_v40 }
 0x290   : >> { %1228 = vst [vmem:[%s1677_s6 + $0x70] sm:$0xff] %v1227_v41 }
 0x291   : >> { %1230 = vst [vmem:[%s1677_s6 + $0x78] sm:$0xff] %v1229_v42  ;;  %s2347_s6 = smov %s1237_s8 }
 0x292 PF: > { %s2308_s26 = sand.u32 15, %s2357_s11   ;;  %s1420_s17 = sshll.u32 %s2235_s13, 7 }
 0x293   : > { %s1242_s14 = scalar_lea.vmem %s2173_s25, %s1420_s17 [#allocation7]   ;;  %s1244_s16 = scalar_lea.vmem %s2229_s12, %s1420_s17  }
 0x294   : > { %p1413_p9 = scmp.le.s32.totalorder %s2308_s26, 0 }
 0x295   : > { %s1691_s15 = smov (!%p1413_p9), %s1244_s16   ;;  %s1695_s21 = smov (!%p1413_p9), %s1242_s14  }
 0x296   : > { %1344 = sbr.rel (%p1413_p9) target bundleno = 675 (0x2a3), region = 157  ;;  %s1699_s22 = smov (!%p1413_p9), 0  }
 0x297   : > { %s1703_s23 = smov (!%p1413_p9), 0  }
 0x29b LB: >> { %v1254_v43 = vld [vmem:[%s1697_s21] sm:$0xff]  ;;  %s1256_s11 = sadd.s32 1, %s1701_s22  ;;  %s1248_s23 = sadd.s32 1, %s1705_s23   ;;  %s1705_s23 = sphi %s1703_s23, %s1248_s23   ;;  %s1701_s22 = sphi %s1699_s22, %s1700_s22   ;;  %s1697_s21 = sphi %s1695_s21, %s1261_s21   ;;  %s1693_s15 = sphi %s1691_s15, %s1262_s15  }
 0x29c   : >> { %1255 = vst [vmem:[%s1693_s15] sm:$0xff] %v1254_v43  ;;  %p1257_p12 = scmp.ge.s32.totalorder %s1256_s11, %s2308_s26  ;;  %p1247_p13 = scmp.ge.s32.totalorder %s1248_s23, %s2308_s26 }
 0x29e   : >> { %s2361_s11 = smov (%p1257_p12, %s1256_s11), 0  ;;  %1250 = sbr.rel (!%p1247_p13) target bundleno = 667 (0x29b), region = 163 }
 0x29f   : >> { %s1414_s25 = sshll.u32 %s2361_s11, 3  ;;  %s1700_s22 = smov %s2361_s11  }
 0x2a0   : >> { %s1261_s21 = scalar_lea.vmem %s1242_s14, %s1414_s25 [#allocation7]   ;;  %s1262_s15 = scalar_lea.vmem %s1244_s16, %s1414_s25  }
 0x2a3 PF: > { %p19_p0 = scmp.ge.s32.totalorder %s1778_s30, 4   ;;  %s2350_s26 = smov %s1665_s27 }
 0x2a4   : > { %s2351_s27 = smov %s1669_s28  ;;  %s2352_s28 = smov %s1788_s10 }
 0x2a5   : > { %s2353_s29 = smov %s1778_s30  ;;  %21 = sbr.rel (!%p19_p0) target bundleno = 6 (0x6), region = 174 }
 0x2aa   :  { %1278 = vsyncpa [#allocation4], 1 }
 0x2ab   :  { %1280 = vsyncpa [#allocation4 + $0x1], 1 }
 0x2ac   :  { %1281 = vsyncpa [#allocation6], 1 }

</bundles_post_ra>
